<compile_context>
chip_gen: v6e
topology: v6e:2x2x1
jax: 0.10.0
libtpu: 0.0.40
codegen_flags: <defaults>
</compile_context>

<pallas_src>
import math
import functools

import jax
import jax.numpy as jnp
from jax.experimental import pallas as pl
from jax.experimental.pallas import tpu as pltpu


# -----------------------------------------------------------------------------
# Kernel: one program per batch element, handling one (S, D) slab.
# -----------------------------------------------------------------------------
def vit_block_kernel(x_ref,
                     g1_ref, beta1_ref,
                     wqkv_ref, bqkv_ref,
                     wo_ref, bo_ref,
                     g2_ref, beta2_ref,
                     w1_ref, b1_ref, w2_ref, b2_ref,
                     out_ref,
                     qkv_scr, heads_scr,
                     *, n_heads, mlp_chunk):
    x = x_ref[0].astype(jnp.float32)            # (S, D); LN / residual math in f32
    S, D = x.shape
    dh = D // n_heads
    Dm = w1_ref.shape[1]
    eps = 1e-5
    scale = 1.0 / math.sqrt(dh)

    def layernorm(v, g, b):
        mu = jnp.mean(v, axis=-1, keepdims=True)
        var = jnp.mean((v - mu) ** 2, axis=-1, keepdims=True)   # biased, like PyTorch
        return (v - mu) * jax.lax.rsqrt(var + eps) * g + b

    # ---- sub-block 1: x + MSA(LN1(x)) --------------------------------------
    xn = layernorm(x, g1_ref[...], beta1_ref[...]).astype(jnp.bfloat16)

    # Fused Q|K|V projection (single MXU call, N = 3D); stage result in bf16
    # VMEM scratch so the (S, 3D) f32 value is never kept live across the head loop.
    qkv_scr[...] = (jnp.dot(xn, wqkv_ref[...], preferred_element_type=jnp.float32)
                    + bqkv_ref[...]).astype(jnp.bfloat16)

    # Per-head attention; each head's output is written into a bf16 (S, D)
    # scratch so the output projection can be one full-K matmul afterwards.
    for h in range(n_heads):                    # small static head count
        lo = h * dh
        q_h = qkv_scr[:, lo:lo + dh]
        k_h = qkv_scr[:, D + lo:D + lo + dh]
        v_h = qkv_scr[:, 2 * D + lo:2 * D + lo + dh]
        s_h = jax.lax.dot_general(q_h, k_h, (((1,), (1,)), ((), ())),
                                  preferred_element_type=jnp.float32) * scale
        m = jnp.max(s_h, axis=-1, keepdims=True)
        p = jnp.exp(s_h - m)
        attn = (p * pl.reciprocal(jnp.sum(p, axis=-1, keepdims=True),
                                  approx=True)).astype(jnp.bfloat16)
        heads_scr[:, lo:lo + dh] = jnp.dot(
            attn, v_h, preferred_element_type=jnp.float32).astype(jnp.bfloat16)

    # Single fused output projection: (S, D) @ (D, D) on the full K dimension.
    msa = jnp.dot(heads_scr[...], wo_ref[...],
                  preferred_element_type=jnp.float32) + bo_ref[...]
    # TODO(synk): nn.Dropout has no deterministic Pallas equivalent; identity (eval mode).
    x1 = x + msa

    # ---- sub-block 2: x + MLP(LN2(x)) --------------------------------------
    xn2 = layernorm(x1, g2_ref[...], beta2_ref[...]).astype(jnp.bfloat16)
    inv_sqrt2 = 1.0 / math.sqrt(2.0)
    mlp = jnp.zeros((S, D), jnp.float32)
    # Chunk the hidden dimension so only (S, mlp_chunk) f32 is live at a time.
    for c0 in range(0, Dm, mlp_chunk):
        c1 = min(c0 + mlp_chunk, Dm)
        hdn = jnp.dot(xn2, w1_ref[:, c0:c1],
                      preferred_element_type=jnp.float32) + b1_ref[:, c0:c1]
        # exact (erf-based) GELU, matching nn.GELU() default
        hdn = 0.5 * hdn * (1.0 + jax.lax.erf(hdn * inv_sqrt2))
        mlp = mlp + jnp.dot(hdn.astype(jnp.bfloat16), w2_ref[c0:c1, :],
                            preferred_element_type=jnp.float32)
    mlp = mlp + b2_ref[...]

    out_ref[0] = (x1 + mlp).astype(out_ref.dtype)


# -----------------------------------------------------------------------------
# Wrapper
# -----------------------------------------------------------------------------
def vit_block(x, params, *, n_heads, mlp_chunk=512):
    B, S, D = x.shape
    Dm = params[8].shape[1]   # fc1 output width
    mlp_chunk = min(mlp_chunk, Dm)

    def build(single_buffer_weights):
        def weight_spec(p):
            nd = p.ndim
            idx = lambda b, _nd=nd: (0,) * _nd   # grid-invariant -> never re-DMA'd
            if single_buffer_weights:
                return pl.BlockSpec(p.shape, idx, pipeline_mode=pl.Buffered(1))
            return pl.BlockSpec(p.shape, idx)

        in_specs = [pl.BlockSpec((1, S, D), lambda b: (b, 0, 0))]
        in_specs += [weight_spec(p) for p in params]

        # VMEM budget: weights resident once (Buffered(1)) or twice (fallback),
        # double-buffered activation in/out tiles, bf16 qkv/heads scratch, and the
        # f32 working set (LN/residual slabs, one SxS score + prob tile, one MLP chunk).
        weight_bytes = sum(int(p.size) * p.dtype.itemsize for p in params)
        weight_resident = weight_bytes if single_buffer_weights else 2 * weight_bytes
        act_bytes = S * D * x.dtype.itemsize
        scratch_bytes = 2 * S * (3 * D) + 2 * S * D          # bf16 qkv + heads scratch
        interm_bytes = 4 * S * (11 * D + mlp_chunk) + 2 * 4 * S * S
        vmem_needed = (weight_resident + 4 * act_bytes + scratch_bytes
                       + interm_bytes + (2 << 20))

        try:
            physical = pltpu.get_tpu_info().vmem_capacity_bytes
        except Exception:
            physical = 64 * 1024 * 1024
        # Leave ~20% headroom for Mosaic internal scratch / spill buffers
        # (≈51 MiB on v7x's 64 MiB, ≈102 MiB on v5e/v6e's 128 MiB).
        cap = int(0.8 * physical)
        vmem_limit = int(min(max(vmem_needed, 32 * 1024 * 1024), cap))

        return pl.pallas_call(
            functools.partial(vit_block_kernel, n_heads=n_heads,
                              mlp_chunk=mlp_chunk),
            out_shape=jax.ShapeDtypeStruct((B, S, D), x.dtype),
            grid=(B,),
            in_specs=in_specs,
            out_specs=pl.BlockSpec((1, S, D), lambda b: (b, 0, 0)),
            scratch_shapes=[pltpu.VMEM((S, 3 * D), jnp.bfloat16),   # staged qkv
                            pltpu.VMEM((S, D), jnp.bfloat16)],      # per-head outputs
            compiler_params=pltpu.CompilerParams(
                dimension_semantics=("parallel",),
                vmem_limit_bytes=vmem_limit),
        )

    try:
        return build(single_buffer_weights=True)(x, *params)
    except Exception:
        # Fallback if this jax build rejects Buffered(1) on pallas_call BlockSpecs.
        return build(single_buffer_weights=False)(x, *params)


# -----------------------------------------------------------------------------
# Parameter initialization (deterministic, mirrors shapes from ViTBlock.__init__)
# Weights in bf16, LN params / biases in f32.
# -----------------------------------------------------------------------------
def init_params(key, hidden_d, mlp_ratio=4):
    D = hidden_d
    Dm = hidden_d * mlp_ratio
    ks = jax.random.split(key, 6)

    def xavier(k, fan_in, fan_out):
        bound = math.sqrt(6.0 / (fan_in + fan_out))
        # stored as (in, out) — already transposed relative to torch Linear.weight
        return jax.random.uniform(k, (fan_in, fan_out), jnp.float32, -bound, bound)

    g1 = jnp.ones((1, D), jnp.float32)
    beta1 = jnp.zeros((1, D), jnp.float32)
    wqkv = jnp.concatenate([xavier(ks[i], D, D) for i in range(3)],
                           axis=1).astype(jnp.bfloat16)          # (D, 3D)
    bqkv = jnp.zeros((1, 3 * D), jnp.float32)
    wo = xavier(ks[3], D, D).astype(jnp.bfloat16)
    bo = jnp.zeros((1, D), jnp.float32)
    g2 = jnp.ones((1, D), jnp.float32)
    beta2 = jnp.zeros((1, D), jnp.float32)
    w_fc1 = xavier(ks[4], D, Dm).astype(jnp.bfloat16)
    b_fc1 = jnp.zeros((1, Dm), jnp.float32)
    w_fc2 = xavier(ks[5], Dm, D).astype(jnp.bfloat16)
    b_fc2 = jnp.zeros((1, D), jnp.float32)

    return (g1, beta1, wqkv, bqkv, wo, bo, g2, beta2, w_fc1, b_fc1, w_fc2, b_fc2)


# -----------------------------------------------------------------------------
# Pure-JAX reference (f32 math with the same bf16-quantized weights/inputs)
# -----------------------------------------------------------------------------
def vit_block_ref(x, params, *, n_heads):
    (g1, beta1, wqkv, bqkv, wo, bo, g2, beta2, w1, b1, w2, b2) = params
    f32 = lambda a: a.astype(jnp.float32)
    x, wqkv, wo, w1, w2 = f32(x), f32(wqkv), f32(wo), f32(w1), f32(w2)
    B, S, D = x.shape
    dh = D // n_heads
    eps = 1e-5

    def ln(v, g, b):
        mu = jnp.mean(v, axis=-1, keepdims=True)
        var = jnp.mean((v - mu) ** 2, axis=-1, keepdims=True)
        return (v - mu) / jnp.sqrt(var + eps) * g + b

    xn = ln(x, g1, beta1)
    qkv = xn @ wqkv + bqkv
    q = qkv[..., 0 * D:1 * D].reshape(B, S, n_heads, dh).transpose(0, 2, 1, 3)
    k = qkv[..., 1 * D:2 * D].reshape(B, S, n_heads, dh).transpose(0, 2, 1, 3)
    v = qkv[..., 2 * D:3 * D].reshape(B, S, n_heads, dh).transpose(0, 2, 1, 3)
    scores = jnp.einsum('bhqd,bhkd->bhqk', q, k) / math.sqrt(dh)
    attn = jax.nn.softmax(scores, axis=-1)
    o = jnp.einsum('bhqk,bhkd->bhqd', attn, v).transpose(0, 2, 1, 3).reshape(B, S, D)
    x1 = x + (o @ wo + bo)

    xn2 = ln(x1, g2, beta2)
    h = xn2 @ w1 + b1
    h = 0.5 * h * (1.0 + jax.lax.erf(h / math.sqrt(2.0)))
    return x1 + (h @ w2 + b2)


if __name__ == "__main__":
    B, S, D, H = 2, 8, 32, 2
    key = jax.random.PRNGKey(0)
    kx, kp = jax.random.split(key)
    x = jax.random.normal(kx, (B, S, D), jnp.float32).astype(jnp.bfloat16)
    params = init_params(kp, D, mlp_ratio=4)

    out = vit_block(x, params, n_heads=H)
    out = jax.block_until_ready(out)

    ref = vit_block_ref(x, params, n_heads=H)
    out32 = out.astype(jnp.float32)
    assert out.shape == (B, S, D)
    rel = jnp.linalg.norm(out32 - ref) / (jnp.linalg.norm(ref) + 1e-6)
    assert float(rel) < 5e-2, f"mismatch vs JAX reference (rel L2 err {float(rel):.4f})"
    print("KERNEL_OK")
</pallas_src>

<mosaic_0001>
module attributes {stable_mosaic.version = 11 : i64} {
  func.func @vit_block_kernel(%arg0: i32, %arg1: memref<1x8x32xbf16, #tpu.memory_space<vmem>>, %arg2: memref<1x32xf32, #tpu.memory_space<vmem>>, %arg3: memref<1x32xf32, #tpu.memory_space<vmem>>, %arg4: memref<32x96xbf16, #tpu.memory_space<vmem>>, %arg5: memref<1x96xf32, #tpu.memory_space<vmem>>, %arg6: memref<32x32xbf16, #tpu.memory_space<vmem>>, %arg7: memref<1x32xf32, #tpu.memory_space<vmem>>, %arg8: memref<1x32xf32, #tpu.memory_space<vmem>>, %arg9: memref<1x32xf32, #tpu.memory_space<vmem>>, %arg10: memref<32x128xbf16, #tpu.memory_space<vmem>>, %arg11: memref<1x128xf32, #tpu.memory_space<vmem>>, %arg12: memref<128x32xbf16, #tpu.memory_space<vmem>>, %arg13: memref<1x32xf32, #tpu.memory_space<vmem>>, %arg14: memref<1x8x32xbf16, #tpu.memory_space<vmem>>, %arg15: memref<8x96xbf16, #tpu.memory_space<vmem>>, %arg16: memref<8x32xbf16, #tpu.memory_space<vmem>>) attributes {dimension_semantics = [#tpu.dimension_semantics<parallel>], iteration_bounds = array<i64: 2>, scalar_prefetch = 0 : i64, scratch_operands = 2 : i64, tpu.core_type = #tpu.core_type<tc>, window_params = [{transform_indices = @transform_0, window_bounds = array<i64: 1, 8, 32>}, {pipeline_mode = #tpu.pipeline_mode<synchronous>, transform_indices = @transform_1, window_bounds = array<i64: 1, 32>}, {pipeline_mode = #tpu.pipeline_mode<synchronous>, transform_indices = @transform_2, window_bounds = array<i64: 1, 32>}, {pipeline_mode = #tpu.pipeline_mode<synchronous>, transform_indices = @transform_3, window_bounds = array<i64: 32, 96>}, {pipeline_mode = #tpu.pipeline_mode<synchronous>, transform_indices = @transform_4, window_bounds = array<i64: 1, 96>}, {pipeline_mode = #tpu.pipeline_mode<synchronous>, transform_indices = @transform_5, window_bounds = array<i64: 32, 32>}, {pipeline_mode = #tpu.pipeline_mode<synchronous>, transform_indices = @transform_6, window_bounds = array<i64: 1, 32>}, {pipeline_mode = #tpu.pipeline_mode<synchronous>, transform_indices = @transform_7, window_bounds = array<i64: 1, 32>}, {pipeline_mode = #tpu.pipeline_mode<synchronous>, transform_indices = @transform_8, window_bounds = array<i64: 1, 32>}, {pipeline_mode = #tpu.pipeline_mode<synchronous>, transform_indices = @transform_9, window_bounds = array<i64: 32, 128>}, {pipeline_mode = #tpu.pipeline_mode<synchronous>, transform_indices = @transform_10, window_bounds = array<i64: 1, 128>}, {pipeline_mode = #tpu.pipeline_mode<synchronous>, transform_indices = @transform_11, window_bounds = array<i64: 128, 32>}, {pipeline_mode = #tpu.pipeline_mode<synchronous>, transform_indices = @transform_12, window_bounds = array<i64: 1, 32>}, {transform_indices = @transform_13, window_bounds = array<i64: 1, 8, 32>}]} {
    %c0 = arith.constant 0 : index
    %c0_0 = arith.constant 0 : index
    %c0_1 = arith.constant 0 : index
    %0 = vector.load %arg1[%c0, %c0_0, %c0_1] : memref<1x8x32xbf16, #tpu.memory_space<vmem>>, vector<1x8x32xbf16>
    %1 = vector.shape_cast %0 : vector<1x8x32xbf16> to vector<8x32xbf16>
    %2 = arith.extf %1 : vector<8x32xbf16> to vector<8x32xf32>
    %c0_2 = arith.constant 0 : index
    %c0_3 = arith.constant 0 : index
    %3 = vector.load %arg2[%c0_2, %c0_3] : memref<1x32xf32, #tpu.memory_space<vmem>>, vector<1x32xf32>
    %c0_4 = arith.constant 0 : index
    %c0_5 = arith.constant 0 : index
    %4 = vector.load %arg3[%c0_4, %c0_5] : memref<1x32xf32, #tpu.memory_space<vmem>>, vector<1x32xf32>
    %cst = arith.constant dense<0.000000e+00> : vector<8xf32>
    %5 = vector.multi_reduction <add>, %2, %cst [1] : vector<8x32xf32> to vector<8xf32>
    %6 = vector.shape_cast %5 : vector<8xf32> to vector<8x1xf32>
    %cst_6 = arith.constant 3.200000e+01 : f32
    %7 = vector.broadcast %cst_6 : f32 to vector<8x1xf32>
    %8 = arith.divf %6, %7 : vector<8x1xf32>
    %9 = vector.broadcast %8 : vector<8x1xf32> to vector<8x32xf32>
    %10 = arith.subf %2, %9 : vector<8x32xf32>
    %11 = arith.mulf %10, %10 : vector<8x32xf32>
    %cst_7 = arith.constant dense<0.000000e+00> : vector<8xf32>
    %12 = vector.multi_reduction <add>, %11, %cst_7 [1] : vector<8x32xf32> to vector<8xf32>
    %13 = vector.shape_cast %12 : vector<8xf32> to vector<8x1xf32>
    %cst_8 = arith.constant 3.200000e+01 : f32
    %14 = vector.broadcast %cst_8 : f32 to vector<8x1xf32>
    %15 = arith.divf %13, %14 : vector<8x1xf32>
    %16 = vector.broadcast %8 : vector<8x1xf32> to vector<8x32xf32>
    %17 = arith.subf %2, %16 : vector<8x32xf32>
    %cst_9 = arith.constant 9.99999974E-6 : f32
    %18 = vector.broadcast %cst_9 : f32 to vector<8x1xf32>
    %19 = arith.addf %15, %18 : vector<8x1xf32>
    %20 = math.rsqrt %19 : vector<8x1xf32>
    %21 = vector.broadcast %20 : vector<8x1xf32> to vector<8x32xf32>
    %22 = arith.mulf %17, %21 : vector<8x32xf32>
    %23 = vector.broadcast %3 : vector<1x32xf32> to vector<8x32xf32>
    %24 = arith.mulf %22, %23 : vector<8x32xf32>
    %25 = vector.broadcast %4 : vector<1x32xf32> to vector<8x32xf32>
    %26 = arith.addf %24, %25 : vector<8x32xf32>
    %27 = arith.truncf %26 : vector<8x32xf32> to vector<8x32xbf16>
    %c0_10 = arith.constant 0 : index
    %c0_11 = arith.constant 0 : index
    %28 = vector.load %arg4[%c0_10, %c0_11] : memref<32x96xbf16, #tpu.memory_space<vmem>>, vector<32x96xbf16>
    %cst_12 = arith.constant dense<0.000000e+00> : vector<8x96xf32>
    %29 = tpu.matmul %27, %28, %cst_12 {dimension_numbers = #tpu.dot_dimension_numbers<[1], [0], [0], [1], [0, 0, 1, 1], [], []>} : vector<8x32xbf16>, vector<32x96xbf16>, vector<8x96xf32> -> vector<8x96xf32>
    %c0_13 = arith.constant 0 : index
    %c0_14 = arith.constant 0 : index
    %30 = vector.load %arg5[%c0_13, %c0_14] : memref<1x96xf32, #tpu.memory_space<vmem>>, vector<1x96xf32>
    %31 = vector.broadcast %30 : vector<1x96xf32> to vector<8x96xf32>
    %32 = arith.addf %29, %31 : vector<8x96xf32>
    %33 = arith.truncf %32 : vector<8x96xf32> to vector<8x96xbf16>
    %c0_15 = arith.constant 0 : index
    %c0_16 = arith.constant 0 : index
    %34 = vector.load %arg15[%c0_15, %c0_16] : memref<8x96xbf16, #tpu.memory_space<vmem>>, vector<8x96xbf16>
    tpu.vector_store %arg15[%c0_15, %c0_16], %33 {strides = array<i32>} : memref<8x96xbf16, #tpu.memory_space<vmem>>, vector<8x96xbf16>,
    %c0_17 = arith.constant 0 : index
    %c0_18 = arith.constant 0 : index
    %35 = vector.load %arg15[%c0_17, %c0_18] : memref<8x96xbf16, #tpu.memory_space<vmem>>, vector<8x16xbf16>
    %c0_19 = arith.constant 0 : index
    %c32 = arith.constant 32 : index
    %36 = vector.load %arg15[%c0_19, %c32] : memref<8x96xbf16, #tpu.memory_space<vmem>>, vector<8x16xbf16>
    %c0_20 = arith.constant 0 : index
    %c64 = arith.constant 64 : index
    %37 = vector.load %arg15[%c0_20, %c64] : memref<8x96xbf16, #tpu.memory_space<vmem>>, vector<8x16xbf16>
    %cst_21 = arith.constant dense<0.000000e+00> : vector<8x8xf32>
    %38 = tpu.matmul %35, %36, %cst_21 {dimension_numbers = #tpu.dot_dimension_numbers<[1], [1], [0], [0], [0, 0, 1, 0], [], []>} : vector<8x16xbf16>, vector<8x16xbf16>, vector<8x8xf32> -> vector<8x8xf32>
    %cst_22 = arith.constant 2.500000e-01 : f32
    %39 = vector.broadcast %cst_22 : f32 to vector<8x8xf32>
    %40 = arith.mulf %38, %39 : vector<8x8xf32>
    %cst_23 = arith.constant dense<0xFF800000> : vector<8xf32>
    %41 = vector.multi_reduction <maximumf>, %40, %cst_23 [1] : vector<8x8xf32> to vector<8xf32>
    %42 = vector.shape_cast %41 : vector<8xf32> to vector<8x1xf32>
    %43 = vector.broadcast %42 : vector<8x1xf32> to vector<8x8xf32>
    %44 = arith.subf %40, %43 : vector<8x8xf32>
    %45 = math.exp %44 : vector<8x8xf32>
    %cst_24 = arith.constant dense<0.000000e+00> : vector<8xf32>
    %46 = vector.multi_reduction <add>, %45, %cst_24 [1] : vector<8x8xf32> to vector<8xf32>
    %47 = vector.shape_cast %46 : vector<8xf32> to vector<8x1xf32>
    %48 = tpu.reciprocal %47 {approx = true} : vector<8x1xf32> -> vector<8x1xf32>
    %49 = vector.broadcast %48 : vector<8x1xf32> to vector<8x8xf32>
    %50 = arith.mulf %45, %49 : vector<8x8xf32>
    %51 = arith.truncf %50 : vector<8x8xf32> to vector<8x8xbf16>
    %cst_25 = arith.constant dense<0.000000e+00> : vector<8x16xf32>
    %52 = tpu.matmul %51, %37, %cst_25 {dimension_numbers = #tpu.dot_dimension_numbers<[1], [0], [0], [1], [0, 0, 1, 1], [], []>} : vector<8x8xbf16>, vector<8x16xbf16>, vector<8x16xf32> -> vector<8x16xf32>
    %53 = arith.truncf %52 : vector<8x16xf32> to vector<8x16xbf16>
    %c0_26 = arith.constant 0 : index
    %c0_27 = arith.constant 0 : index
    %54 = vector.load %arg16[%c0_26, %c0_27] : memref<8x32xbf16, #tpu.memory_space<vmem>>, vector<8x16xbf16>
    tpu.vector_store %arg16[%c0_26, %c0_27], %53 {strides = array<i32>} : memref<8x32xbf16, #tpu.memory_space<vmem>>, vector<8x16xbf16>,
    %c0_28 = arith.constant 0 : index
    %c16 = arith.constant 16 : index
    %55 = vector.load %arg15[%c0_28, %c16] : memref<8x96xbf16, #tpu.memory_space<vmem>>, vector<8x16xbf16>
    %c0_29 = arith.constant 0 : index
    %c48 = arith.constant 48 : index
    %56 = vector.load %arg15[%c0_29, %c48] : memref<8x96xbf16, #tpu.memory_space<vmem>>, vector<8x16xbf16>
    %c0_30 = arith.constant 0 : index
    %c80 = arith.constant 80 : index
    %57 = vector.load %arg15[%c0_30, %c80] : memref<8x96xbf16, #tpu.memory_space<vmem>>, vector<8x16xbf16>
    %cst_31 = arith.constant dense<0.000000e+00> : vector<8x8xf32>
    %58 = tpu.matmul %55, %56, %cst_31 {dimension_numbers = #tpu.dot_dimension_numbers<[1], [1], [0], [0], [0, 0, 1, 0], [], []>} : vector<8x16xbf16>, vector<8x16xbf16>, vector<8x8xf32> -> vector<8x8xf32>
    %cst_32 = arith.constant 2.500000e-01 : f32
    %59 = vector.broadcast %cst_32 : f32 to vector<8x8xf32>
    %60 = arith.mulf %58, %59 : vector<8x8xf32>
    %cst_33 = arith.constant dense<0xFF800000> : vector<8xf32>
    %61 = vector.multi_reduction <maximumf>, %60, %cst_33 [1] : vector<8x8xf32> to vector<8xf32>
    %62 = vector.shape_cast %61 : vector<8xf32> to vector<8x1xf32>
    %63 = vector.broadcast %62 : vector<8x1xf32> to vector<8x8xf32>
    %64 = arith.subf %60, %63 : vector<8x8xf32>
    %65 = math.exp %64 : vector<8x8xf32>
    %cst_34 = arith.constant dense<0.000000e+00> : vector<8xf32>
    %66 = vector.multi_reduction <add>, %65, %cst_34 [1] : vector<8x8xf32> to vector<8xf32>
    %67 = vector.shape_cast %66 : vector<8xf32> to vector<8x1xf32>
    %68 = tpu.reciprocal %67 {approx = true} : vector<8x1xf32> -> vector<8x1xf32>
    %69 = vector.broadcast %68 : vector<8x1xf32> to vector<8x8xf32>
    %70 = arith.mulf %65, %69 : vector<8x8xf32>
    %71 = arith.truncf %70 : vector<8x8xf32> to vector<8x8xbf16>
    %cst_35 = arith.constant dense<0.000000e+00> : vector<8x16xf32>
    %72 = tpu.matmul %71, %57, %cst_35 {dimension_numbers = #tpu.dot_dimension_numbers<[1], [0], [0], [1], [0, 0, 1, 1], [], []>} : vector<8x8xbf16>, vector<8x16xbf16>, vector<8x16xf32> -> vector<8x16xf32>
    %73 = arith.truncf %72 : vector<8x16xf32> to vector<8x16xbf16>
    %c0_36 = arith.constant 0 : index
    %c16_37 = arith.constant 16 : index
    %74 = vector.load %arg16[%c0_36, %c16_37] : memref<8x32xbf16, #tpu.memory_space<vmem>>, vector<8x16xbf16>
    tpu.vector_store %arg16[%c0_36, %c16_37], %73 {strides = array<i32>} : memref<8x32xbf16, #tpu.memory_space<vmem>>, vector<8x16xbf16>,
    %c0_38 = arith.constant 0 : index
    %c0_39 = arith.constant 0 : index
    %75 = vector.load %arg16[%c0_38, %c0_39] : memref<8x32xbf16, #tpu.memory_space<vmem>>, vector<8x32xbf16>
    %c0_40 = arith.constant 0 : index
    %c0_41 = arith.constant 0 : index
    %76 = vector.load %arg6[%c0_40, %c0_41] : memref<32x32xbf16, #tpu.memory_space<vmem>>, vector<32x32xbf16>
    %cst_42 = arith.constant dense<0.000000e+00> : vector<8x32xf32>
    %77 = tpu.matmul %75, %76, %cst_42 {dimension_numbers = #tpu.dot_dimension_numbers<[1], [0], [0], [1], [0, 0, 1, 1], [], []>} : vector<8x32xbf16>, vector<32x32xbf16>, vector<8x32xf32> -> vector<8x32xf32>
    %c0_43 = arith.constant 0 : index
    %c0_44 = arith.constant 0 : index
    %78 = vector.load %arg7[%c0_43, %c0_44] : memref<1x32xf32, #tpu.memory_space<vmem>>, vector<1x32xf32>
    %79 = vector.broadcast %78 : vector<1x32xf32> to vector<8x32xf32>
    %80 = arith.addf %77, %79 : vector<8x32xf32>
    %81 = arith.addf %2, %80 : vector<8x32xf32>
    %c0_45 = arith.constant 0 : index
    %c0_46 = arith.constant 0 : index
    %82 = vector.load %arg8[%c0_45, %c0_46] : memref<1x32xf32, #tpu.memory_space<vmem>>, vector<1x32xf32>
    %c0_47 = arith.constant 0 : index
    %c0_48 = arith.constant 0 : index
    %83 = vector.load %arg9[%c0_47, %c0_48] : memref<1x32xf32, #tpu.memory_space<vmem>>, vector<1x32xf32>
    %cst_49 = arith.constant dense<0.000000e+00> : vector<8xf32>
    %84 = vector.multi_reduction <add>, %81, %cst_49 [1] : vector<8x32xf32> to vector<8xf32>
    %85 = vector.shape_cast %84 : vector<8xf32> to vector<8x1xf32>
    %cst_50 = arith.constant 3.200000e+01 : f32
    %86 = vector.broadcast %cst_50 : f32 to vector<8x1xf32>
    %87 = arith.divf %85, %86 : vector<8x1xf32>
    %88 = vector.broadcast %87 : vector<8x1xf32> to vector<8x32xf32>
    %89 = arith.subf %81, %88 : vector<8x32xf32>
    %90 = arith.mulf %89, %89 : vector<8x32xf32>
    %cst_51 = arith.constant dense<0.000000e+00> : vector<8xf32>
    %91 = vector.multi_reduction <add>, %90, %cst_51 [1] : vector<8x32xf32> to vector<8xf32>
    %92 = vector.shape_cast %91 : vector<8xf32> to vector<8x1xf32>
    %cst_52 = arith.constant 3.200000e+01 : f32
    %93 = vector.broadcast %cst_52 : f32 to vector<8x1xf32>
    %94 = arith.divf %92, %93 : vector<8x1xf32>
    %95 = vector.broadcast %87 : vector<8x1xf32> to vector<8x32xf32>
    %96 = arith.subf %81, %95 : vector<8x32xf32>
    %cst_53 = arith.constant 9.99999974E-6 : f32
    %97 = vector.broadcast %cst_53 : f32 to vector<8x1xf32>
    %98 = arith.addf %94, %97 : vector<8x1xf32>
    %99 = math.rsqrt %98 : vector<8x1xf32>
    %100 = vector.broadcast %99 : vector<8x1xf32> to vector<8x32xf32>
    %101 = arith.mulf %96, %100 : vector<8x32xf32>
    %102 = vector.broadcast %82 : vector<1x32xf32> to vector<8x32xf32>
    %103 = arith.mulf %101, %102 : vector<8x32xf32>
    %104 = vector.broadcast %83 : vector<1x32xf32> to vector<8x32xf32>
    %105 = arith.addf %103, %104 : vector<8x32xf32>
    %106 = arith.truncf %105 : vector<8x32xf32> to vector<8x32xbf16>
    %cst_54 = arith.constant 0.000000e+00 : f32
    %107 = vector.broadcast %cst_54 : f32 to vector<8x32xf32>
    %c0_55 = arith.constant 0 : index
    %c0_56 = arith.constant 0 : index
    %108 = vector.load %arg10[%c0_55, %c0_56] : memref<32x128xbf16, #tpu.memory_space<vmem>>, vector<32x128xbf16>
    %cst_57 = arith.constant dense<0.000000e+00> : vector<8x128xf32>
    %109 = tpu.matmul %106, %108, %cst_57 {dimension_numbers = #tpu.dot_dimension_numbers<[1], [0], [0], [1], [0, 0, 1, 1], [], []>} : vector<8x32xbf16>, vector<32x128xbf16>, vector<8x128xf32> -> vector<8x128xf32>
    %c0_58 = arith.constant 0 : index
    %c0_59 = arith.constant 0 : index
    %110 = vector.load %arg11[%c0_58, %c0_59] : memref<1x128xf32, #tpu.memory_space<vmem>>, vector<1x128xf32>
    %111 = vector.broadcast %110 : vector<1x128xf32> to vector<8x128xf32>
    %112 = arith.addf %109, %111 : vector<8x128xf32>
    %cst_60 = arith.constant 5.000000e-01 : f32
    %113 = vector.broadcast %cst_60 : f32 to vector<8x128xf32>
    %114 = arith.mulf %113, %112 : vector<8x128xf32>
    %cst_61 = arith.constant 0.707106769 : f32
    %115 = vector.broadcast %cst_61 : f32 to vector<8x128xf32>
    %116 = arith.mulf %112, %115 : vector<8x128xf32>
    %117 = math.erf %116 : vector<8x128xf32>
    %cst_62 = arith.constant 1.000000e+00 : f32
    %118 = vector.broadcast %cst_62 : f32 to vector<8x128xf32>
    %119 = arith.addf %118, %117 : vector<8x128xf32>
    %120 = arith.mulf %114, %119 : vector<8x128xf32>
    %121 = arith.truncf %120 : vector<8x128xf32> to vector<8x128xbf16>
    %c0_63 = arith.constant 0 : index
    %c0_64 = arith.constant 0 : index
    %122 = vector.load %arg12[%c0_63, %c0_64] : memref<128x32xbf16, #tpu.memory_space<vmem>>, vector<128x32xbf16>
    %cst_65 = arith.constant dense<0.000000e+00> : vector<8x32xf32>
    %123 = tpu.matmul %121, %122, %cst_65 {dimension_numbers = #tpu.dot_dimension_numbers<[1], [0], [0], [1], [0, 0, 1, 1], [], []>} : vector<8x128xbf16>, vector<128x32xbf16>, vector<8x32xf32> -> vector<8x32xf32>
    %124 = arith.addf %107, %123 : vector<8x32xf32>
    %c0_66 = arith.constant 0 : index
    %c0_67 = arith.constant 0 : index
    %125 = vector.load %arg13[%c0_66, %c0_67] : memref<1x32xf32, #tpu.memory_space<vmem>>, vector<1x32xf32>
    %126 = vector.broadcast %125 : vector<1x32xf32> to vector<8x32xf32>
    %127 = arith.addf %124, %126 : vector<8x32xf32>
    %128 = arith.addf %81, %127 : vector<8x32xf32>
    %129 = arith.truncf %128 : vector<8x32xf32> to vector<8x32xbf16>
    %c0_68 = arith.constant 0 : index
    %c0_69 = arith.constant 0 : index
    %c0_70 = arith.constant 0 : index
    %130 = vector.load %arg14[%c0_68, %c0_69, %c0_70] : memref<1x8x32xbf16, #tpu.memory_space<vmem>>, vector<1x8x32xbf16>
    %131 = vector.shape_cast %130 : vector<1x8x32xbf16> to vector<8x32xbf16>
    %132 = vector.shape_cast %129 : vector<8x32xbf16> to vector<1x8x32xbf16>
    tpu.vector_store %arg14[%c0_68, %c0_69, %c0_70], %132 {strides = array<i32>} : memref<1x8x32xbf16, #tpu.memory_space<vmem>>, vector<1x8x32xbf16>,
    return
  }
  func.func @transform_0(%arg0: i32) -> (i32, i32, i32) {
    %c0_i32 = arith.constant 0 : i32
    %c0_i32_0 = arith.constant 0 : i32
    %c0_i32_1 = arith.constant 0 : i32
    return %arg0, %c0_i32, %c0_i32_0 : i32, i32, i32
  }
  func.func @transform_1(%arg0: i32) -> (i32, i32) {
    %c0_i32 = arith.constant 0 : i32
    %c0_i32_0 = arith.constant 0 : i32
    %c0_i32_1 = arith.constant 0 : i32
    return %c0_i32, %c0_i32_0 : i32, i32
  }
  func.func @transform_2(%arg0: i32) -> (i32, i32) {
    %c0_i32 = arith.constant 0 : i32
    %c0_i32_0 = arith.constant 0 : i32
    %c0_i32_1 = arith.constant 0 : i32
    return %c0_i32, %c0_i32_0 : i32, i32
  }
  func.func @transform_3(%arg0: i32) -> (i32, i32) {
    %c0_i32 = arith.constant 0 : i32
    %c0_i32_0 = arith.constant 0 : i32
    %c0_i32_1 = arith.constant 0 : i32
    return %c0_i32, %c0_i32_0 : i32, i32
  }
  func.func @transform_4(%arg0: i32) -> (i32, i32) {
    %c0_i32 = arith.constant 0 : i32
    %c0_i32_0 = arith.constant 0 : i32
    %c0_i32_1 = arith.constant 0 : i32
    return %c0_i32, %c0_i32_0 : i32, i32
  }
  func.func @transform_5(%arg0: i32) -> (i32, i32) {
    %c0_i32 = arith.constant 0 : i32
    %c0_i32_0 = arith.constant 0 : i32
    %c0_i32_1 = arith.constant 0 : i32
    return %c0_i32, %c0_i32_0 : i32, i32
  }
  func.func @transform_6(%arg0: i32) -> (i32, i32) {
    %c0_i32 = arith.constant 0 : i32
    %c0_i32_0 = arith.constant 0 : i32
    %c0_i32_1 = arith.constant 0 : i32
    return %c0_i32, %c0_i32_0 : i32, i32
  }
  func.func @transform_7(%arg0: i32) -> (i32, i32) {
    %c0_i32 = arith.constant 0 : i32
    %c0_i32_0 = arith.constant 0 : i32
    %c0_i32_1 = arith.constant 0 : i32
    return %c0_i32, %c0_i32_0 : i32, i32
  }
  func.func @transform_8(%arg0: i32) -> (i32, i32) {
    %c0_i32 = arith.constant 0 : i32
    %c0_i32_0 = arith.constant 0 : i32
    %c0_i32_1 = arith.constant 0 : i32
    return %c0_i32, %c0_i32_0 : i32, i32
  }
  func.func @transform_9(%arg0: i32) -> (i32, i32) {
    %c0_i32 = arith.constant 0 : i32
    %c0_i32_0 = arith.constant 0 : i32
    %c0_i32_1 = arith.constant 0 : i32
    return %c0_i32, %c0_i32_0 : i32, i32
  }
  func.func @transform_10(%arg0: i32) -> (i32, i32) {
    %c0_i32 = arith.constant 0 : i32
    %c0_i32_0 = arith.constant 0 : i32
    %c0_i32_1 = arith.constant 0 : i32
    return %c0_i32, %c0_i32_0 : i32, i32
  }
  func.func @transform_11(%arg0: i32) -> (i32, i32) {
    %c0_i32 = arith.constant 0 : i32
    %c0_i32_0 = arith.constant 0 : i32
    %c0_i32_1 = arith.constant 0 : i32
    return %c0_i32, %c0_i32_0 : i32, i32
  }
  func.func @transform_12(%arg0: i32) -> (i32, i32) {
    %c0_i32 = arith.constant 0 : i32
    %c0_i32_0 = arith.constant 0 : i32
    %c0_i32_1 = arith.constant 0 : i32
    return %c0_i32, %c0_i32_0 : i32, i32
  }
  func.func @transform_13(%arg0: i32) -> (i32, i32, i32) {
    %c0_i32 = arith.constant 0 : i32
    %c0_i32_0 = arith.constant 0 : i32
    %c0_i32_1 = arith.constant 0 : i32
    return %arg0, %c0_i32, %c0_i32_0 : i32, i32, i32
  }
}

module attributes {stable_mosaic.version = 11 : i64} {
  func.func @vit_block_kernel(%arg0: i32, %arg1: memref<1x8x32xbf16, #tpu.memory_space<vmem>>, %arg2: memref<1x32xf32, #tpu.memory_space<vmem>>, %arg3: memref<1x32xf32, #tpu.memory_space<vmem>>, %arg4: memref<32x96xbf16, #tpu.memory_space<vmem>>, %arg5: memref<1x96xf32, #tpu.memory_space<vmem>>, %arg6: memref<32x32xbf16, #tpu.memory_space<vmem>>, %arg7: memref<1x32xf32, #tpu.memory_space<vmem>>, %arg8: memref<1x32xf32, #tpu.memory_space<vmem>>, %arg9: memref<1x32xf32, #tpu.memory_space<vmem>>, %arg10: memref<32x128xbf16, #tpu.memory_space<vmem>>, %arg11: memref<1x128xf32, #tpu.memory_space<vmem>>, %arg12: memref<128x32xbf16, #tpu.memory_space<vmem>>, %arg13: memref<1x32xf32, #tpu.memory_space<vmem>>, %arg14: memref<1x8x32xbf16, #tpu.memory_space<vmem>>, %arg15: memref<8x96xbf16, #tpu.memory_space<vmem>>, %arg16: memref<8x32xbf16, #tpu.memory_space<vmem>>) attributes {dimension_semantics = [#tpu.dimension_semantics<parallel>], iteration_bounds = array<i64: 2>, scalar_prefetch = 0 : i64, scratch_operands = 2 : i64, tpu.core_type = #tpu.core_type<tc>, window_params = [{transform_indices = @transform_0, window_bounds = array<i64: 1, 8, 32>}, {pipeline_mode = #tpu.pipeline_mode<synchronous>, transform_indices = @transform_1, window_bounds = array<i64: 1, 32>}, {pipeline_mode = #tpu.pipeline_mode<synchronous>, transform_indices = @transform_2, window_bounds = array<i64: 1, 32>}, {pipeline_mode = #tpu.pipeline_mode<synchronous>, transform_indices = @transform_3, window_bounds = array<i64: 32, 96>}, {pipeline_mode = #tpu.pipeline_mode<synchronous>, transform_indices = @transform_4, window_bounds = array<i64: 1, 96>}, {pipeline_mode = #tpu.pipeline_mode<synchronous>, transform_indices = @transform_5, window_bounds = array<i64: 32, 32>}, {pipeline_mode = #tpu.pipeline_mode<synchronous>, transform_indices = @transform_6, window_bounds = array<i64: 1, 32>}, {pipeline_mode = #tpu.pipeline_mode<synchronous>, transform_indices = @transform_7, window_bounds = array<i64: 1, 32>}, {pipeline_mode = #tpu.pipeline_mode<synchronous>, transform_indices = @transform_8, window_bounds = array<i64: 1, 32>}, {pipeline_mode = #tpu.pipeline_mode<synchronous>, transform_indices = @transform_9, window_bounds = array<i64: 32, 128>}, {pipeline_mode = #tpu.pipeline_mode<synchronous>, transform_indices = @transform_10, window_bounds = array<i64: 1, 128>}, {pipeline_mode = #tpu.pipeline_mode<synchronous>, transform_indices = @transform_11, window_bounds = array<i64: 128, 32>}, {pipeline_mode = #tpu.pipeline_mode<synchronous>, transform_indices = @transform_12, window_bounds = array<i64: 1, 32>}, {transform_indices = @transform_13, window_bounds = array<i64: 1, 8, 32>}]} {
    %c0 = arith.constant 0 : index
    %c0_0 = arith.constant 0 : index
    %c0_1 = arith.constant 0 : index
    %0 = vector.load %arg1[%c0, %c0_0, %c0_1] : memref<1x8x32xbf16, #tpu.memory_space<vmem>>, vector<1x8x32xbf16>
    %1 = vector.shape_cast %0 : vector<1x8x32xbf16> to vector<8x32xbf16>
    %2 = arith.extf %1 : vector<8x32xbf16> to vector<8x32xf32>
    %c0_2 = arith.constant 0 : index
    %c0_3 = arith.constant 0 : index
    %3 = vector.load %arg2[%c0_2, %c0_3] : memref<1x32xf32, #tpu.memory_space<vmem>>, vector<1x32xf32>
    %c0_4 = arith.constant 0 : index
    %c0_5 = arith.constant 0 : index
    %4 = vector.load %arg3[%c0_4, %c0_5] : memref<1x32xf32, #tpu.memory_space<vmem>>, vector<1x32xf32>
    %cst = arith.constant dense<0.000000e+00> : vector<8xf32>
    %5 = vector.multi_reduction <add>, %2, %cst [1] : vector<8x32xf32> to vector<8xf32>
    %6 = vector.shape_cast %5 : vector<8xf32> to vector<8x1xf32>
    %cst_6 = arith.constant 3.200000e+01 : f32
    %7 = vector.broadcast %cst_6 : f32 to vector<8x1xf32>
    %8 = arith.divf %6, %7 : vector<8x1xf32>
    %9 = vector.broadcast %8 : vector<8x1xf32> to vector<8x32xf32>
    %10 = arith.subf %2, %9 : vector<8x32xf32>
    %11 = arith.mulf %10, %10 : vector<8x32xf32>
    %cst_7 = arith.constant dense<0.000000e+00> : vector<8xf32>
    %12 = vector.multi_reduction <add>, %11, %cst_7 [1] : vector<8x32xf32> to vector<8xf32>
    %13 = vector.shape_cast %12 : vector<8xf32> to vector<8x1xf32>
    %cst_8 = arith.constant 3.200000e+01 : f32
    %14 = vector.broadcast %cst_8 : f32 to vector<8x1xf32>
    %15 = arith.divf %13, %14 : vector<8x1xf32>
    %16 = vector.broadcast %8 : vector<8x1xf32> to vector<8x32xf32>
    %17 = arith.subf %2, %16 : vector<8x32xf32>
    %cst_9 = arith.constant 9.99999974E-6 : f32
    %18 = vector.broadcast %cst_9 : f32 to vector<8x1xf32>
    %19 = arith.addf %15, %18 : vector<8x1xf32>
    %20 = math.rsqrt %19 : vector<8x1xf32>
    %21 = vector.broadcast %20 : vector<8x1xf32> to vector<8x32xf32>
    %22 = arith.mulf %17, %21 : vector<8x32xf32>
    %23 = vector.broadcast %3 : vector<1x32xf32> to vector<8x32xf32>
    %24 = arith.mulf %22, %23 : vector<8x32xf32>
    %25 = vector.broadcast %4 : vector<1x32xf32> to vector<8x32xf32>
    %26 = arith.addf %24, %25 : vector<8x32xf32>
    %27 = arith.truncf %26 : vector<8x32xf32> to vector<8x32xbf16>
    %c0_10 = arith.constant 0 : index
    %c0_11 = arith.constant 0 : index
    %28 = vector.load %arg4[%c0_10, %c0_11] : memref<32x96xbf16, #tpu.memory_space<vmem>>, vector<32x96xbf16>
    %cst_12 = arith.constant dense<0.000000e+00> : vector<8x96xf32>
    %29 = tpu.matmul %27, %28, %cst_12 {dimension_numbers = #tpu.dot_dimension_numbers<[1], [0], [0], [1], [0, 0, 1, 1], [], []>} : vector<8x32xbf16>, vector<32x96xbf16>, vector<8x96xf32> -> vector<8x96xf32>
    %c0_13 = arith.constant 0 : index
    %c0_14 = arith.constant 0 : index
    %30 = vector.load %arg5[%c0_13, %c0_14] : memref<1x96xf32, #tpu.memory_space<vmem>>, vector<1x96xf32>
    %31 = vector.broadcast %30 : vector<1x96xf32> to vector<8x96xf32>
    %32 = arith.addf %29, %31 : vector<8x96xf32>
    %33 = arith.truncf %32 : vector<8x96xf32> to vector<8x96xbf16>
    %c0_15 = arith.constant 0 : index
    %c0_16 = arith.constant 0 : index
    %34 = vector.load %arg15[%c0_15, %c0_16] : memref<8x96xbf16, #tpu.memory_space<vmem>>, vector<8x96xbf16>
    tpu.vector_store %arg15[%c0_15, %c0_16], %33 {strides = array<i32>} : memref<8x96xbf16, #tpu.memory_space<vmem>>, vector<8x96xbf16>,
    %c0_17 = arith.constant 0 : index
    %c0_18 = arith.constant 0 : index
    %35 = vector.load %arg15[%c0_17, %c0_18] : memref<8x96xbf16, #tpu.memory_space<vmem>>, vector<8x16xbf16>
    %c0_19 = arith.constant 0 : index
    %c32 = arith.constant 32 : index
    %36 = vector.load %arg15[%c0_19, %c32] : memref<8x96xbf16, #tpu.memory_space<vmem>>, vector<8x16xbf16>
    %c0_20 = arith.constant 0 : index
    %c64 = arith.constant 64 : index
    %37 = vector.load %arg15[%c0_20, %c64] : memref<8x96xbf16, #tpu.memory_space<vmem>>, vector<8x16xbf16>
    %cst_21 = arith.constant dense<0.000000e+00> : vector<8x8xf32>
    %38 = tpu.matmul %35, %36, %cst_21 {dimension_numbers = #tpu.dot_dimension_numbers<[1], [1], [0], [0], [0, 0, 1, 0], [], []>} : vector<8x16xbf16>, vector<8x16xbf16>, vector<8x8xf32> -> vector<8x8xf32>
    %cst_22 = arith.constant 2.500000e-01 : f32
    %39 = vector.broadcast %cst_22 : f32 to vector<8x8xf32>
    %40 = arith.mulf %38, %39 : vector<8x8xf32>
    %cst_23 = arith.constant dense<0xFF800000> : vector<8xf32>
    %41 = vector.multi_reduction <maximumf>, %40, %cst_23 [1] : vector<8x8xf32> to vector<8xf32>
    %42 = vector.shape_cast %41 : vector<8xf32> to vector<8x1xf32>
    %43 = vector.broadcast %42 : vector<8x1xf32> to vector<8x8xf32>
    %44 = arith.subf %40, %43 : vector<8x8xf32>
    %45 = math.exp %44 : vector<8x8xf32>
    %cst_24 = arith.constant dense<0.000000e+00> : vector<8xf32>
    %46 = vector.multi_reduction <add>, %45, %cst_24 [1] : vector<8x8xf32> to vector<8xf32>
    %47 = vector.shape_cast %46 : vector<8xf32> to vector<8x1xf32>
    %48 = tpu.reciprocal %47 {approx = true} : vector<8x1xf32> -> vector<8x1xf32>
    %49 = vector.broadcast %48 : vector<8x1xf32> to vector<8x8xf32>
    %50 = arith.mulf %45, %49 : vector<8x8xf32>
    %51 = arith.truncf %50 : vector<8x8xf32> to vector<8x8xbf16>
    %cst_25 = arith.constant dense<0.000000e+00> : vector<8x16xf32>
    %52 = tpu.matmul %51, %37, %cst_25 {dimension_numbers = #tpu.dot_dimension_numbers<[1], [0], [0], [1], [0, 0, 1, 1], [], []>} : vector<8x8xbf16>, vector<8x16xbf16>, vector<8x16xf32> -> vector<8x16xf32>
    %53 = arith.truncf %52 : vector<8x16xf32> to vector<8x16xbf16>
    %c0_26 = arith.constant 0 : index
    %c0_27 = arith.constant 0 : index
    %54 = vector.load %arg16[%c0_26, %c0_27] : memref<8x32xbf16, #tpu.memory_space<vmem>>, vector<8x16xbf16>
    tpu.vector_store %arg16[%c0_26, %c0_27], %53 {strides = array<i32>} : memref<8x32xbf16, #tpu.memory_space<vmem>>, vector<8x16xbf16>,
    %c0_28 = arith.constant 0 : index
    %c16 = arith.constant 16 : index
    %55 = vector.load %arg15[%c0_28, %c16] : memref<8x96xbf16, #tpu.memory_space<vmem>>, vector<8x16xbf16>
    %c0_29 = arith.constant 0 : index
    %c48 = arith.constant 48 : index
    %56 = vector.load %arg15[%c0_29, %c48] : memref<8x96xbf16, #tpu.memory_space<vmem>>, vector<8x16xbf16>
    %c0_30 = arith.constant 0 : index
    %c80 = arith.constant 80 : index
    %57 = vector.load %arg15[%c0_30, %c80] : memref<8x96xbf16, #tpu.memory_space<vmem>>, vector<8x16xbf16>
    %cst_31 = arith.constant dense<0.000000e+00> : vector<8x8xf32>
    %58 = tpu.matmul %55, %56, %cst_31 {dimension_numbers = #tpu.dot_dimension_numbers<[1], [1], [0], [0], [0, 0, 1, 0], [], []>} : vector<8x16xbf16>, vector<8x16xbf16>, vector<8x8xf32> -> vector<8x8xf32>
    %cst_32 = arith.constant 2.500000e-01 : f32
    %59 = vector.broadcast %cst_32 : f32 to vector<8x8xf32>
    %60 = arith.mulf %58, %59 : vector<8x8xf32>
    %cst_33 = arith.constant dense<0xFF800000> : vector<8xf32>
    %61 = vector.multi_reduction <maximumf>, %60, %cst_33 [1] : vector<8x8xf32> to vector<8xf32>
    %62 = vector.shape_cast %61 : vector<8xf32> to vector<8x1xf32>
    %63 = vector.broadcast %62 : vector<8x1xf32> to vector<8x8xf32>
    %64 = arith.subf %60, %63 : vector<8x8xf32>
    %65 = math.exp %64 : vector<8x8xf32>
    %cst_34 = arith.constant dense<0.000000e+00> : vector<8xf32>
    %66 = vector.multi_reduction <add>, %65, %cst_34 [1] : vector<8x8xf32> to vector<8xf32>
    %67 = vector.shape_cast %66 : vector<8xf32> to vector<8x1xf32>
    %68 = tpu.reciprocal %67 {approx = true} : vector<8x1xf32> -> vector<8x1xf32>
    %69 = vector.broadcast %68 : vector<8x1xf32> to vector<8x8xf32>
    %70 = arith.mulf %65, %69 : vector<8x8xf32>
    %71 = arith.truncf %70 : vector<8x8xf32> to vector<8x8xbf16>
    %cst_35 = arith.constant dense<0.000000e+00> : vector<8x16xf32>
    %72 = tpu.matmul %71, %57, %cst_35 {dimension_numbers = #tpu.dot_dimension_numbers<[1], [0], [0], [1], [0, 0, 1, 1], [], []>} : vector<8x8xbf16>, vector<8x16xbf16>, vector<8x16xf32> -> vector<8x16xf32>
    %73 = arith.truncf %72 : vector<8x16xf32> to vector<8x16xbf16>
    %c0_36 = arith.constant 0 : index
    %c16_37 = arith.constant 16 : index
    %74 = vector.load %arg16[%c0_36, %c16_37] : memref<8x32xbf16, #tpu.memory_space<vmem>>, vector<8x16xbf16>
    tpu.vector_store %arg16[%c0_36, %c16_37], %73 {strides = array<i32>} : memref<8x32xbf16, #tpu.memory_space<vmem>>, vector<8x16xbf16>,
    %c0_38 = arith.constant 0 : index
    %c0_39 = arith.constant 0 : index
    %75 = vector.load %arg16[%c0_38, %c0_39] : memref<8x32xbf16, #tpu.memory_space<vmem>>, vector<8x32xbf16>
    %c0_40 = arith.constant 0 : index
    %c0_41 = arith.constant 0 : index
    %76 = vector.load %arg6[%c0_40, %c0_41] : memref<32x32xbf16, #tpu.memory_space<vmem>>, vector<32x32xbf16>
    %cst_42 = arith.constant dense<0.000000e+00> : vector<8x32xf32>
    %77 = tpu.matmul %75, %76, %cst_42 {dimension_numbers = #tpu.dot_dimension_numbers<[1], [0], [0], [1], [0, 0, 1, 1], [], []>} : vector<8x32xbf16>, vector<32x32xbf16>, vector<8x32xf32> -> vector<8x32xf32>
    %c0_43 = arith.constant 0 : index
    %c0_44 = arith.constant 0 : index
    %78 = vector.load %arg7[%c0_43, %c0_44] : memref<1x32xf32, #tpu.memory_space<vmem>>, vector<1x32xf32>
    %79 = vector.broadcast %78 : vector<1x32xf32> to vector<8x32xf32>
    %80 = arith.addf %77, %79 : vector<8x32xf32>
    %81 = arith.addf %2, %80 : vector<8x32xf32>
    %c0_45 = arith.constant 0 : index
    %c0_46 = arith.constant 0 : index
    %82 = vector.load %arg8[%c0_45, %c0_46] : memref<1x32xf32, #tpu.memory_space<vmem>>, vector<1x32xf32>
    %c0_47 = arith.constant 0 : index
    %c0_48 = arith.constant 0 : index
    %83 = vector.load %arg9[%c0_47, %c0_48] : memref<1x32xf32, #tpu.memory_space<vmem>>, vector<1x32xf32>
    %cst_49 = arith.constant dense<0.000000e+00> : vector<8xf32>
    %84 = vector.multi_reduction <add>, %81, %cst_49 [1] : vector<8x32xf32> to vector<8xf32>
    %85 = vector.shape_cast %84 : vector<8xf32> to vector<8x1xf32>
    %cst_50 = arith.constant 3.200000e+01 : f32
    %86 = vector.broadcast %cst_50 : f32 to vector<8x1xf32>
    %87 = arith.divf %85, %86 : vector<8x1xf32>
    %88 = vector.broadcast %87 : vector<8x1xf32> to vector<8x32xf32>
    %89 = arith.subf %81, %88 : vector<8x32xf32>
    %90 = arith.mulf %89, %89 : vector<8x32xf32>
    %cst_51 = arith.constant dense<0.000000e+00> : vector<8xf32>
    %91 = vector.multi_reduction <add>, %90, %cst_51 [1] : vector<8x32xf32> to vector<8xf32>
    %92 = vector.shape_cast %91 : vector<8xf32> to vector<8x1xf32>
    %cst_52 = arith.constant 3.200000e+01 : f32
    %93 = vector.broadcast %cst_52 : f32 to vector<8x1xf32>
    %94 = arith.divf %92, %93 : vector<8x1xf32>
    %95 = vector.broadcast %87 : vector<8x1xf32> to vector<8x32xf32>
    %96 = arith.subf %81, %95 : vector<8x32xf32>
    %cst_53 = arith.constant 9.99999974E-6 : f32
    %97 = vector.broadcast %cst_53 : f32 to vector<8x1xf32>
    %98 = arith.addf %94, %97 : vector<8x1xf32>
    %99 = math.rsqrt %98 : vector<8x1xf32>
    %100 = vector.broadcast %99 : vector<8x1xf32> to vector<8x32xf32>
    %101 = arith.mulf %96, %100 : vector<8x32xf32>
    %102 = vector.broadcast %82 : vector<1x32xf32> to vector<8x32xf32>
    %103 = arith.mulf %101, %102 : vector<8x32xf32>
    %104 = vector.broadcast %83 : vector<1x32xf32> to vector<8x32xf32>
    %105 = arith.addf %103, %104 : vector<8x32xf32>
    %106 = arith.truncf %105 : vector<8x32xf32> to vector<8x32xbf16>
    %cst_54 = arith.constant 0.000000e+00 : f32
    %107 = vector.broadcast %cst_54 : f32 to vector<8x32xf32>
    %c0_55 = arith.constant 0 : index
    %c0_56 = arith.constant 0 : index
    %108 = vector.load %arg10[%c0_55, %c0_56] : memref<32x128xbf16, #tpu.memory_space<vmem>>, vector<32x128xbf16>
    %cst_57 = arith.constant dense<0.000000e+00> : vector<8x128xf32>
    %109 = tpu.matmul %106, %108, %cst_57 {dimension_numbers = #tpu.dot_dimension_numbers<[1], [0], [0], [1], [0, 0, 1, 1], [], []>} : vector<8x32xbf16>, vector<32x128xbf16>, vector<8x128xf32> -> vector<8x128xf32>
    %c0_58 = arith.constant 0 : index
    %c0_59 = arith.constant 0 : index
    %110 = vector.load %arg11[%c0_58, %c0_59] : memref<1x128xf32, #tpu.memory_space<vmem>>, vector<1x128xf32>
    %111 = vector.broadcast %110 : vector<1x128xf32> to vector<8x128xf32>
    %112 = arith.addf %109, %111 : vector<8x128xf32>
    %cst_60 = arith.constant 5.000000e-01 : f32
    %113 = vector.broadcast %cst_60 : f32 to vector<8x128xf32>
    %114 = arith.mulf %113, %112 : vector<8x128xf32>
    %cst_61 = arith.constant 0.707106769 : f32
    %115 = vector.broadcast %cst_61 : f32 to vector<8x128xf32>
    %116 = arith.mulf %112, %115 : vector<8x128xf32>
    %117 = math.erf %116 : vector<8x128xf32>
    %cst_62 = arith.constant 1.000000e+00 : f32
    %118 = vector.broadcast %cst_62 : f32 to vector<8x128xf32>
    %119 = arith.addf %118, %117 : vector<8x128xf32>
    %120 = arith.mulf %114, %119 : vector<8x128xf32>
    %121 = arith.truncf %120 : vector<8x128xf32> to vector<8x128xbf16>
    %c0_63 = arith.constant 0 : index
    %c0_64 = arith.constant 0 : index
    %122 = vector.load %arg12[%c0_63, %c0_64] : memref<128x32xbf16, #tpu.memory_space<vmem>>, vector<128x32xbf16>
    %cst_65 = arith.constant dense<0.000000e+00> : vector<8x32xf32>
    %123 = tpu.matmul %121, %122, %cst_65 {dimension_numbers = #tpu.dot_dimension_numbers<[1], [0], [0], [1], [0, 0, 1, 1], [], []>} : vector<8x128xbf16>, vector<128x32xbf16>, vector<8x32xf32> -> vector<8x32xf32>
    %124 = arith.addf %107, %123 : vector<8x32xf32>
    %c0_66 = arith.constant 0 : index
    %c0_67 = arith.constant 0 : index
    %125 = vector.load %arg13[%c0_66, %c0_67] : memref<1x32xf32, #tpu.memory_space<vmem>>, vector<1x32xf32>
    %126 = vector.broadcast %125 : vector<1x32xf32> to vector<8x32xf32>
    %127 = arith.addf %124, %126 : vector<8x32xf32>
    %128 = arith.addf %81, %127 : vector<8x32xf32>
    %129 = arith.truncf %128 : vector<8x32xf32> to vector<8x32xbf16>
    %c0_68 = arith.constant 0 : index
    %c0_69 = arith.constant 0 : index
    %c0_70 = arith.constant 0 : index
    %130 = vector.load %arg14[%c0_68, %c0_69, %c0_70] : memref<1x8x32xbf16, #tpu.memory_space<vmem>>, vector<1x8x32xbf16>
    %131 = vector.shape_cast %130 : vector<1x8x32xbf16> to vector<8x32xbf16>
    %132 = vector.shape_cast %129 : vector<8x32xbf16> to vector<1x8x32xbf16>
    tpu.vector_store %arg14[%c0_68, %c0_69, %c0_70], %132 {strides = array<i32>} : memref<1x8x32xbf16, #tpu.memory_space<vmem>>, vector<1x8x32xbf16>,
    return
  }
  func.func @transform_0(%arg0: i32) -> (i32, i32, i32) {
    %c0_i32 = arith.constant 0 : i32
    %c0_i32_0 = arith.constant 0 : i32
    %c0_i32_1 = arith.constant 0 : i32
    return %arg0, %c0_i32, %c0_i32_0 : i32, i32, i32
  }
  func.func @transform_1(%arg0: i32) -> (i32, i32) {
    %c0_i32 = arith.constant 0 : i32
    %c0_i32_0 = arith.constant 0 : i32
    %c0_i32_1 = arith.constant 0 : i32
    return %c0_i32, %c0_i32_0 : i32, i32
  }
  func.func @transform_2(%arg0: i32) -> (i32, i32) {
    %c0_i32 = arith.constant 0 : i32
    %c0_i32_0 = arith.constant 0 : i32
    %c0_i32_1 = arith.constant 0 : i32
    return %c0_i32, %c0_i32_0 : i32, i32
  }
  func.func @transform_3(%arg0: i32) -> (i32, i32) {
    %c0_i32 = arith.constant 0 : i32
    %c0_i32_0 = arith.constant 0 : i32
    %c0_i32_1 = arith.constant 0 : i32
    return %c0_i32, %c0_i32_0 : i32, i32
  }
  func.func @transform_4(%arg0: i32) -> (i32, i32) {
    %c0_i32 = arith.constant 0 : i32
    %c0_i32_0 = arith.constant 0 : i32
    %c0_i32_1 = arith.constant 0 : i32
    return %c0_i32, %c0_i32_0 : i32, i32
  }
  func.func @transform_5(%arg0: i32) -> (i32, i32) {
    %c0_i32 = arith.constant 0 : i32
    %c0_i32_0 = arith.constant 0 : i32
    %c0_i32_1 = arith.constant 0 : i32
    return %c0_i32, %c0_i32_0 : i32, i32
  }
  func.func @transform_6(%arg0: i32) -> (i32, i32) {
    %c0_i32 = arith.constant 0 : i32
    %c0_i32_0 = arith.constant 0 : i32
    %c0_i32_1 = arith.constant 0 : i32
    return %c0_i32, %c0_i32_0 : i32, i32
  }
  func.func @transform_7(%arg0: i32) -> (i32, i32) {
    %c0_i32 = arith.constant 0 : i32
    %c0_i32_0 = arith.constant 0 : i32
    %c0_i32_1 = arith.constant 0 : i32
    return %c0_i32, %c0_i32_0 : i32, i32
  }
  func.func @transform_8(%arg0: i32) -> (i32, i32) {
    %c0_i32 = arith.constant 0 : i32
    %c0_i32_0 = arith.constant 0 : i32
    %c0_i32_1 = arith.constant 0 : i32
    return %c0_i32, %c0_i32_0 : i32, i32
  }
  func.func @transform_9(%arg0: i32) -> (i32, i32) {
    %c0_i32 = arith.constant 0 : i32
    %c0_i32_0 = arith.constant 0 : i32
    %c0_i32_1 = arith.constant 0 : i32
    return %c0_i32, %c0_i32_0 : i32, i32
  }
  func.func @transform_10(%arg0: i32) -> (i32, i32) {
    %c0_i32 = arith.constant 0 : i32
    %c0_i32_0 = arith.constant 0 : i32
    %c0_i32_1 = arith.constant 0 : i32
    return %c0_i32, %c0_i32_0 : i32, i32
  }
  func.func @transform_11(%arg0: i32) -> (i32, i32) {
    %c0_i32 = arith.constant 0 : i32
    %c0_i32_0 = arith.constant 0 : i32
    %c0_i32_1 = arith.constant 0 : i32
    return %c0_i32, %c0_i32_0 : i32, i32
  }
  func.func @transform_12(%arg0: i32) -> (i32, i32) {
    %c0_i32 = arith.constant 0 : i32
    %c0_i32_0 = arith.constant 0 : i32
    %c0_i32_1 = arith.constant 0 : i32
    return %c0_i32, %c0_i32_0 : i32, i32
  }
  func.func @transform_13(%arg0: i32) -> (i32, i32, i32) {
    %c0_i32 = arith.constant 0 : i32
    %c0_i32_0 = arith.constant 0 : i32
    %c0_i32_1 = arith.constant 0 : i32
    return %arg0, %c0_i32, %c0_i32_0 : i32, i32, i32
  }
}

</mosaic_0001>

<bundles_post_ra>
// kernel: tpu_custom_call.1
= control target key start
LH: loop header
LB: loop body
LE: loop exit
PB: predicated region body
PF: predicated region fallthrough
CT: control target
= control target key end

     0   :  { %s1712_s0 = inlined_call_operand.vmem [shape: bf16[2,8,32], index: 0, kind: input, shape index: {}]   ;;  %s1713_s1 = inlined_call_operand.vmem [shape: f32[1,32], index: 1, kind: input, shape index: {}]   ;;  %s1714_s2 = inlined_call_operand.vmem [shape: f32[1,32], index: 2, kind: input, shape index: {}]   ;;  %s1715_s3 = inlined_call_operand.vmem [shape: bf16[32,96], index: 3, kind: input, shape index: {}]   ;;  %s1716_s4 = inlined_call_operand.vmem [shape: f32[1,96], index: 4, kind: input, shape index: {}]   ;;  %s1717_s5 = inlined_call_operand.vmem [shape: bf16[32,32], index: 5, kind: input, shape index: {}]   ;;  %s1718_s6 = inlined_call_operand.vmem [shape: f32[1,32], index: 6, kind: input, shape index: {}]   ;;  %s1719_s7 = inlined_call_operand.vmem [shape: f32[1,32], index: 7, kind: input, shape index: {}]   ;;  %s1720_s8 = inlined_call_operand.vmem [shape: f32[1,32], index: 8, kind: input, shape index: {}]   ;;  %s1721_s9 = inlined_call_operand.vmem [shape: bf16[32,128], index: 9, kind: input, shape index: {}]   ;;  %s1722_s10 = inlined_call_operand.vmem [shape: f32[1,128], index: 10, kind: input, shape index: {}]   ;;  %s1723_s11 = inlined_call_operand.vmem [shape: bf16[128,32], index: 11, kind: input, shape index: {}]   ;;  %s1724_s12 = inlined_call_operand.vmem [shape: f32[1,32], index: 12, kind: input, shape index: {}]   ;;  %s1725_s13 = inlined_call_operand.hbm [shape: bf16[2,8,32], index: 13, kind: output, shape index: {}]  }
   0x1   :  { %1726 = sst [smem:[#allocation7_spill]] %s1712_s0 }
   0x2   :  { %1727 = sst [smem:[#allocation8_spill]] %s1713_s1 }
   0x3   :  { %1728 = sst [smem:[#allocation9_spill]] %s1714_s2 }
   0x4   :  { %18 = vsyncpa [#allocation5], 0 }
   0x5   :  { %20 = vsyncpa [#allocation5 + $0x1], 0  ;;  %s1496_s25 = smov 0   ;;  %s1498_s26 = smov 0  }
   0x6   :  { %s1500_s27 = smov 0   ;;  %s1502_s28 = smov 0  }
   0x7 LB: > { %s1517_s29 = sadd.s32 4294967295, %s1415_s28   ;;  %s1141_s30 = sadd.s32 4294967294, %s1415_s28   ;;  %s1415_s28 = sphi %s1502_s28, %s1737_s28   ;;  %s1411_s27 = sphi %s1500_s27, %s1736_s27   ;;  %s1407_s26 = sphi %s1498_s26, %s1735_s26   ;;  %s1403_s25 = sphi %s1496_s25, %s1734_s25  }
   0x8   : > { %s1521_s14 = sadd.s32 1, %s1415_s28   ;;  %s311_s15 = sadd.s32 1, %s1411_s27 }
   0x9   : > { %s308_s16 = ssub.s32 %s1415_s28, %s1521_s14  ;;  %p321_p0 = scmp.ne.s32.totalorder %s1411_s27, %s1407_s26 }
   0xa   : > { %p309_p1 = scmp.eq.s32.totalorder %s308_s16, 0  ;;  %p322_p2 = scmp.eq.s32.totalorder %s1517_s29, 1 }
   0xb   : > { %p327_p3 = scmp.ne.s32.totalorder %s1407_s26, %s1403_s25  ;;  %p328_p4 = scmp.eq.s32.totalorder %s1141_s30, 1 }
   0xc   : > { %s1532_s17 = scalar_select %p309_p1, %s1411_s27, %s311_s15  }
   0xd   : > { %p1534_p5 = por %p322_p2, %p321_p0  ;;  %p1538_p6 = por %p328_p4, %p327_p3 }
   0xe   : > { %p1144_p7 = scmp.ge.s32.totalorder %s1415_s28, 1  ;;  %p389_p8 = scmp.lt.s32.totalorder %s1415_s28, 3 }
  0x10   : > { %p390_p9 = pnand %p1144_p7, %p389_p8 }
  0x11   : > { %p432_p10 = scmp.lt.s32.totalorder (!%p390_p9), %s1517_s29, 1  ;;  %s1731_s0 = sld [smem:[#allocation7_spill]] (!%p390_p9) }
  0x12   : > { %393 = sbr.rel (%p390_p9) target bundleno = 2442 (0x98a), region = 72  ;;  %s1732_s1 = sld [smem:[#allocation8_spill]] (!%p390_p9) }
  0x13   : > { %s1733_s2 = sld [smem:[#allocation9_spill]] (!%p390_p9)  ;;  %s1419_s16 = smov (!%p390_p9), 112  }
  0x14   : > { %s1422_s22 = smov (!%p390_p9), 48   ;;  %s1423_s23 = smov (!%p390_p9), 64  }
  0x15   : > { %s429_s30 = sand.u32 (!%p390_p9), 1, %s1407_s26  }
  0x16   : > { %s1145_s15 = sshll.u32 (!%p390_p9), %s429_s30, 2 }
  0x17   : > { %s433_s20 = scalar_select %p432_p10, %s1517_s29, 1  ;;  %vm441_vm0 = vcmask 261120   ;;  %v1325_v8 = vld [vmem:[%s1715_s3 + $0x8] sm:$0xff]   ;;  %v1417_v9 = vmov 0.0   ;;  %vm1418_vm1 = vmmov 0   ;;  %v1326_v10 = vld [vmem:[%s1715_s3] sm:$0xff]  }
  0x18   : > { %1210 = vmatprep.subr.bf16.mxu0 %v1417_v9  ;;  %1214 = vmatprep.mubr.msk.bf16.mxu0 %vm1418_vm1, %v1417_v9  ;;  %v1147_v15 = vld [vmem:[%s1732_s1] ss:$0 sm:$0xff]  ;;  %vm538_vm2 = vcmask 781312   ;;  %vm546_vm3 = vcmask 130048   ;;  %vm594_vm4 = vcmask 64512   ;;  %vm612_vm5 = vcmask 1043456  }
  0x19   : > { %s1146_s21 = sshll.u32 %s433_s20, 2  ;;  %1211 = vmatpush3.bf16.msra.mxu0 %v1325_v8  ;;  %1230 = vmatprep.subr.bf16.mxu1 %v1417_v9  ;;  %v1148_v17 = vld [vmem:[%s1733_s2] ss:$0 sm:$0xff]  ;;  %s1420_s20 = smov 96   ;;  %vm657_vm6 = vcmask 125952   ;;  %vm781_vm7 = vcmask 257152  }
  0x1a   : > { %s435_s24 = scalar_lea.vmem %s1731_s0, %s1146_s21  ;;  %1212 = vmatprep.subr.bf16.mxu0 %v1417_v9  ;;  %1232 = vmatprep.mubr.msk.bf16.mxu1 %vm1418_vm1, %v1417_v9  ;;  %v1149_v21 = vld [vmem:[%s1716_s4] ss:$0 sm:$0xff]  ;;  %s1421_s21 = smov 80   ;;  %vm1066_vm8 = vcmask 257024  }
  0x1b   : > { %v437_v0 = vld [vmem:[%s435_s24] sm:$0xf] }
  0x1c   : > { %v1549_v1 = vunpack.c.l.bf16 %v437_v0 }
  0x1d   : > { %1213 = vmatpush3.bf16.msra.mxu0 %v1326_v10  ;;  %v1330_v10 = vld [vmem:[%s1717_s5] sm:$0xff]  }
  0x1e   : > { %v442_v2 = vsel %vm441_vm0, %v1549_v1, 0.0  ;;  %1218 = vmatprep.subr.bf16.mxu0 %v1417_v9 }
  0x1f   : > { %443 = vadd.xlane.f32.xlu0 %v442_v2 }
  0xa8   : > { %v444_v3 = vpop.xlane.xlu0 %443 }
  0xa9   : > { %v446_v4 = vmul.f32 0.03125, %v444_v3 }
  0xab   : > { %v447_v5 = vsub.f32 %v1549_v1, %v446_v4 }
  0xad   : > { %v448_v6 = vmul.f32 %v447_v5, %v447_v5 }
  0xaf   : > { %v449_v7 = vsel %vm441_vm0, %v448_v6, 0.0 }
  0xb0   : > { %450 = vadd.xlane.f32.xlu0 %v449_v7  ;;  %v1329_v7 = vld [vmem:[%s1717_s5 + $0x8] sm:$0xff]  }
 0x139   : > { %v451_v11 = vpop.xlane.xlu0 %450 }
 0x13a   : > { %v452_v12 = vmul.f32 0.03125, %v451_v11 }
 0x13c   : > { %v453_v13 = vadd.f32 1e-05, %v452_v12 }
 0x13e   : > { %1341 = vrsqrt.f32 %v453_v13 }
 0x14b   : > { %v1342_v14 = vpop.eup %1341 }
 0x14c   : > { %v455_v16 = vmul.f32 %v1342_v14, %v447_v5 }
 0x14e   : > { %v462_v18 = vmul.f32 %v1147_v15, %v455_v16 }
 0x150   : > { %v469_v19 = vadd.f32 %v1148_v17, %v462_v18 }
 0x152   : > { %v470_v20 = vpack.c.bf16 %v469_v19, %v469_v19 }
 0x154   : > { %1215 = vmatmul.mubr.msk.bf16.vlgmr.msra.gmra.mxu0 %vm441_vm0, %v470_v20 }
 0x155   : > { %1220 = vmatprep.mubr.msk.bf16.mxu0 %vm1418_vm1, %v1417_v9 }
 0x214   : > { %v531_v22 = vpop.f32.mrf.mxu0 }
 0x215   : > { %v532_v23 = vadd.f32 %v1149_v21, %v531_v22  ;;  %v1160_v22 = vld [vmem:[%s1718_s6] ss:$0 sm:$0xff] }
 0x216   : > { %v1216_v24 = vpop.f32.mrf.mxu0 }
 0x217   : > { %v537_v25 = vpack.c.bf16 %v532_v23, %v532_v23 }
 0x218   : > { %v534_v26 = vpop.f32.mrf.mxu0 }
 0x219   : > { %539 = vst.msk [vmem:[#allocation2] sm:$0xf] %vm538_vm2, %v537_v25 }
 0x21a   : > { %v1217_v27 = vpop.f32.mrf.mxu0 }
 0x220   : > { %v1327_v28 = vld [vmem:[#allocation2] ss:$0 sps:$4 sm:$0xff]  }
 0x221   : > { %v540_v29 = vld [vmem:[#allocation2] sm:$0xf]  ;;  %663 = vrot.lane.b32.xlu0 %v1327_v28, %s1419_s16  ;;  %s1069_s16 = scalar_lea.sflag [#allocation5], %s429_s30 }
 0x222   : > { %v1153_v30 = vcombine.low %v540_v29, %v540_v29 }
 0x224   : > { %544 = vrot.lane.b32.xlu1 %v1153_v30, %s1420_s20  ;;  %s1424_s20 = smov 16  }
 0x228   : > { %665 = vrot.lane.b32.xlu1 %v1327_v28, %s1421_s21  ;;  %s1180_s21 = sshll.u32 %s1517_s29, 6  ;;  %s1425_s29 = smov [#allocation4]  }
 0x229   : > { %s1677_s1 = scalar_lea.hbm %s1725_s13, %s1180_s21 }
 0x293   : > { %v664_v35 = vpop.permute.xlu0 %663 }
 0x296   : > { %v545_v31 = vpop.permute.xlu1 %544 }
 0x297   : > { %v551_v32 = vsel %vm546_vm3, %v545_v31, 0 }
 0x298   : > { %1219 = vmatpush3.bf16.xpose.msra.mxu0 %v551_v32 }
 0x299   : > { %1224 = vmatprep.subr.bf16.mxu0 %v1417_v9 }
 0x29a   : > { %v666_v33 = vpop.permute.xlu1 %665 }
 0x29b   : > { %v671_v34 = vsel %vm546_vm3, %v666_v33, 0 }
 0x29c   : > { %1231 = vmatpush3.bf16.xpose.msra.mxu1 %v671_v34 }
 0x29d   : > { %1242 = vmatprep.subr.bf16.mxu1 %v1417_v9 }
 0x29f   : > { %1221 = vmatmul.mubr.msk.bf16.vlgmr.msra.gmra.mxu0 %vm546_vm3, %v540_v29 }
 0x2a0   : > { %1226 = vmatprep.mubr.msk.bf16.mxu0 %vm1418_vm1, %v1417_v9 }
 0x2a3   : > { %1233 = vmatmul.mubr.msk.bf16.vlgmr.msra.gmra.mxu1 %vm546_vm3, %v664_v35  ;;  %v1331_v35 = vld [vmem:[%s1721_s9 + $0x8] sm:$0xff]  }
 0x2a4   : > { %1246 = vmatprep.mubr.msk.bf16.mxu1 %vm1418_vm1, %v1417_v9  ;;  %1243 = vmatpush3.bf16.msra.mxu1 %v1329_v7 }
 0x2a5   : > { %1244 = vmatprep.subr.bf16.mxu1 %v1417_v9 }
 0x2a8   : > { %1245 = vmatpush3.bf16.msra.mxu1 %v1330_v10 }
 0x2a9   : > { %1258 = vmatprep.subr.bf16.mxu1 %v1417_v9 }
 0x35f   : > { %v587_v36 = vpop.f32.mrf.mxu0 }
 0x360   : > { %v593_v37 = vmul.f32 0.25, %v587_v36  ;;  %v1333_v36 = vld [vmem:[%s1723_s11 + $0x38] sm:$0xff]  }
 0x361   : > { %v1222_v38 = vpop.f32.mrf.mxu0 }
 0x362   : > { %v595_v39 = vsel %vm594_vm4, %v593_v37, -inf }
 0x363   : > { %v707_v40 = vpop.f32.mrf.mxu1  ;;  %596 = vmax.xlane.f32.xlu1 %v595_v39  ;;  %v590_v41 = vpop.f32.mrf.mxu0 }
 0x364   : > { %v713_v42 = vmul.f32 0.25, %v707_v40 }
 0x365   : > { %v1223_v43 = vpop.f32.mrf.mxu0  ;;  %v1234_v44 = vpop.f32.mrf.mxu1 }
 0x366   : > { %v714_v45 = vsel %vm594_vm4, %v713_v42, -inf  ;;  %v1165_v44 = vld [vmem:[%s1720_s8] ss:$0 sm:$0xff] }
 0x367   : > { %715 = vmax.xlane.f32.xlu0 %v714_v45  ;;  %v710_v46 = vpop.f32.mrf.mxu1 }
 0x369   : > { %v1235_v47 = vpop.f32.mrf.mxu1 }
 0x37d   : > { %726 = vrot.lane.b32.xlu0 %v1327_v28, %s1422_s22  ;;  %s431_s22 = scalar_lea.vmem [#allocation4], %s1145_s15  ;;  %s1359_s15 = sshll.u32 %s1425_s29, 4  ;;  %s1360_s15 = int_to_ptr.vmem [resolvable:$false] %s1359_s15 }
 0x37e   : > { %s1361_s2 = scalar_lea.vmem %s1360_s15, 128 }
 0x3ec   : > { %v597_v48 = vpop.xlane.xlu1 %596 }
 0x3ed   : > { %v598_v49 = vsub.f32 %v593_v37, %v597_v48  ;;  %v1334_v37 = vld [vmem:[%s1723_s11 + $0x30] sm:$0xff]   ;;  %v1335_v48 = vld [vmem:[%s1723_s11 + $0x28] sm:$0xff]  }
 0x3ef   : > { %v599_v50 = vmul.f32 1.442695, %v598_v49  ;;  %v1336_v49 = vld [vmem:[%s1723_s11 + $0x20] sm:$0xff]  }
 0x3f0   : > { %v716_v51 = vpop.xlane.xlu0 %715 }
 0x3f1   : > { %1343 = vpow2.f32 %v599_v50  ;;  %v717_v52 = vsub.f32 %v713_v42, %v716_v51  ;;  %v1164_v42 = vld [vmem:[%s1719_s7] ss:$0 sm:$0xff]  ;;  %v1337_v50 = vld [vmem:[%s1723_s11 + $0x18] sm:$0xff]   ;;  %v1338_v51 = vld [vmem:[%s1723_s11 + $0x10] sm:$0xff]  }
 0x3f3   : > { %v718_v53 = vmul.f32 1.442695, %v717_v52  ;;  %v1339_v52 = vld [vmem:[%s1723_s11 + $0x8] sm:$0xff]  }
 0x3f4   : > { %v727_v0 = vpop.permute.xlu0 %726 }
 0x3f5   : > { %1345 = vpow2.f32 %v718_v53  ;;  %v732_v4 = vsel %vm612_vm5, %v727_v0, 0  ;;  %v1340_v53 = vld [vmem:[%s1723_s11] sm:$0xff]  }
 0x3fe   : > { %v1344_v54 = vpop.eup %1343 }
 0x3ff   : > { %v601_v55 = vsel %vm594_vm4, %v1344_v54, 0.0 }
 0x400   : > { %602 = vadd.xlane.f32.xlu1 %v601_v55 }
 0x402   : > { %v1346_v56 = vpop.eup %1345 }
 0x403   : > { %v720_v57 = vsel %vm594_vm4, %v1346_v56, 0.0 }
 0x404   : > { %721 = vadd.xlane.f32.xlu1 %v720_v57 }
 0x415   : > { %607 = vrot.lane.b32.xlu1 %v1153_v30, %s1423_s23  ;;  %s1082_s23 = sshll.u32 %s431_s22, 4  ;;  %s1083_s23 = int_to_ptr.vmem [resolvable:$true] %s1082_s23 }
 0x416   : > { %p1362_p0 = scmp.lt.s32.totalorder %s1083_s23, %s1360_s15 }
 0x489   : > { %v603_v58 = vpop.xlane.xlu1 %602 }
 0x48a   : > { %1347 = vrcp.f32 %v603_v58 }
 0x48d   : > { %v722_v59 = vpop.xlane.xlu1 %721 }
 0x48e   : > { %1349 = vrcp.f32 %v722_v59 }
 0x491   : > { %v608_v60 = vpop.permute.xlu1 %607 }
 0x492   : > { %v614_v61 = vsel %vm612_vm5, %v608_v60, 0 }
 0x493   : > { %1225 = vmatpush3.bf16.msra.mxu0 %v614_v61 }
 0x494   : > { %1236 = vmatprep.subr.bf16.mxu0 %v1417_v9 }
 0x497   : > { %v1348_v62 = vpop.eup %1347 }
 0x498   : > { %v605_v63 = vmul.f32 %v1348_v62, %v1344_v54  ;;  %v1166_v54 = vld [vmem:[%s1722_s10] ss:$0 sm:$0xff] }
 0x49a   : > { %v606_v2 = vpack.c.bf16 %v605_v63, %v605_v63 }
 0x49b   : > { %v1350_v3 = vpop.eup %1349 }
 0x49c   : > { %1227 = vmatmul.mubr.msk.bf16.vlgmr.msra.gmra.mxu0 %vm594_vm4, %v606_v2  ;;  %v724_v5 = vmul.f32 %v1350_v3, %v1346_v56  ;;  %v1170_v2 = vld [vmem:[%s1724_s12] ss:$0 sm:$0xff] }
 0x49d   : > { %1237 = vmatpush3.bf16.msra.mxu0 %v732_v4  ;;  %1238 = vmatprep.mubr.msk.bf16.mxu0 %vm1418_vm1, %v1417_v9 }
 0x49e   : > { %1250 = vmatprep.subr.bf16.mxu0 %v1417_v9  ;;  %v725_v6 = vpack.c.bf16 %v724_v5, %v724_v5 }
 0x4a4   : > { %1239 = vmatmul.mubr.msk.bf16.vlgmr.msra.gmra.mxu0 %vm594_vm4, %v725_v6 }
 0x4a5   : > { %1254 = vmatprep.mubr.msk.bf16.mxu0 %vm1418_vm1, %v1417_v9  ;;  %1251 = vmatpush3.bf16.msra.mxu0 %v1331_v35 }
 0x4a6   : > { %1252 = vmatprep.subr.bf16.mxu0 %v1417_v9 }
 0x55c   : > { %v650_v8 = vpop.f32.mrf.mxu0 }
 0x55d   : > { %v656_v11 = vpack.c.bf16 %v650_v8, %v650_v8 }
 0x55e   : > { %v1228_v12 = vpop.f32.mrf.mxu0 }
 0x55f   : > { %658 = vst.msk [vmem:[#allocation3] sm:$0xf] %vm657_vm6, %v656_v11 }
 0x560   : > { %v653_v13 = vpop.f32.mrf.mxu0 }
 0x562   : > { %v1229_v14 = vpop.f32.mrf.mxu0 }
 0x564   : > { %v768_v15 = vpop.f32.mrf.mxu0 }
 0x565   : > { %v1183_v16 = vpack.c.bf16 %v768_v15, %v768_v15 }
 0x566   : > { %v1240_v17 = vpop.f32.mrf.mxu0 }
 0x567   : > { %778 = vrot.lane.b32.xlu1 %v1183_v16, %s1424_s20  ;;  %s1355_s20 = scalar_lea.vmem %s1083_s23, 64 }
 0x568   : > { %v771_v18 = vpop.f32.mrf.mxu0  ;;  %p1356_p11 = scmp.ne.s32.totalorder %s1083_s23, %s1355_s20  ;;  %p1363_p1 = scmp.lt.s32.totalorder %s1361_s2, %s1355_s20 }
 0x56a   : > { %v1241_v19 = vpop.f32.mrf.mxu0  ;;  %p1357_p12 = pnand %p1356_p11, %p1534_p5  ;;  %p1364_p2 = por %p1363_p1, %p1362_p0 }
 0x56c   : > { %p1358_p13 = pneg %p1357_p12 }
 0x56e   : > { %p1365_p3 = pnand %p1364_p2, %p1358_p13 }
 0x5d9   : > { %v779_v20 = vpop.permute.xlu1 %778 }
 0x5da   : > { %782 = vst.msk [vmem:[#allocation3] sm:$0xf] %vm781_vm7, %v779_v20 }
 0x5e1   : > { %v783_v21 = vld [vmem:[#allocation3] sm:$0xf] }
 0x5e2   : > { %1247 = vmatmul.mubr.msk.bf16.vlgmr.msra.gmra.mxu1 %vm441_vm0, %v783_v21 }
 0x5e3   : > { %1274 = vmatprep.mubr.msk.bf16.mxu1 %vm1418_vm1, %v1417_v9  ;;  %1259 = vmatpush3.bf16.msra.mxu1 %v1333_v36 }
 0x5e4   : > { %1260 = vmatprep.subr.bf16.mxu1 %v1417_v9 }
 0x5e7   : > { %1261 = vmatpush3.bf16.msra.mxu1 %v1334_v37 }
 0x5e8   : > { %1262 = vmatprep.subr.bf16.mxu1 %v1417_v9 }
 0x5eb   : > { %1263 = vmatpush3.bf16.msra.mxu1 %v1335_v48 }
 0x5ec   : > { %1264 = vmatprep.subr.bf16.mxu1 %v1417_v9 }
 0x5ef   : > { %1265 = vmatpush3.bf16.msra.mxu1 %v1336_v49 }
 0x5f0   : > { %1266 = vmatprep.subr.bf16.mxu1 %v1417_v9 }
 0x5f3   : > { %1267 = vmatpush3.bf16.msra.mxu1 %v1337_v50 }
 0x5f4   : > { %1268 = vmatprep.subr.bf16.mxu1 %v1417_v9 }
 0x5f7   : > { %1269 = vmatpush3.bf16.msra.mxu1 %v1338_v51 }
 0x5f8   : > { %1270 = vmatprep.subr.bf16.mxu1 %v1417_v9 }
 0x5fb   : > { %1271 = vmatpush3.bf16.msra.mxu1 %v1339_v52 }
 0x5fc   : > { %1272 = vmatprep.subr.bf16.mxu1 %v1417_v9 }
 0x5ff   : > { %1273 = vmatpush3.bf16.msra.mxu1 %v1340_v53 }
 0x6a2   : > { %v844_v23 = vpop.f32.mrf.mxu1 }
 0x6a3   : > { %v845_v24 = vadd.f32 %v1160_v22, %v844_v23 }
 0x6a4   : > { %v1248_v25 = vpop.f32.mrf.mxu1 }
 0x6a5   : > { %v1614_v26 = vadd.f32 %v845_v24, %v1549_v1  ;;  %v1332_v1 = vld [vmem:[%s1721_s9] sm:$0xff]  }
 0x6a6   : > { %v847_v27 = vpop.f32.mrf.mxu1  ;;  %1253 = vmatpush3.bf16.msra.mxu0 %v1332_v1 }
 0x6a7   : > { %v853_v28 = vsel %vm441_vm0, %v1614_v26, 0.0 }
 0x6a8   : > { %854 = vadd.xlane.f32.xlu1 %v853_v28  ;;  %v1249_v29 = vpop.f32.mrf.mxu1 }
 0x731   : > { %v855_v30 = vpop.xlane.xlu1 %854 }
 0x732   : > { %v856_v31 = vmul.f32 0.03125, %v855_v30 }
 0x734   : > { %v857_v32 = vsub.f32 %v1614_v26, %v856_v31 }
 0x736   : > { %v858_v33 = vmul.f32 %v857_v32, %v857_v32 }
 0x738   : > { %v859_v34 = vsel %vm441_vm0, %v858_v33, 0.0 }
 0x739   : > { %860 = vadd.xlane.f32.xlu0 %v859_v34 }
 0x7c2   : > { %v861_v38 = vpop.xlane.xlu0 %860 }
 0x7c3   : > { %v862_v39 = vmul.f32 0.03125, %v861_v38 }
 0x7c5   : > { %v863_v40 = vadd.f32 1e-05, %v862_v39 }
 0x7c7   : > { %1351 = vrsqrt.f32 %v863_v40 }
 0x7d4   : > { %v1352_v41 = vpop.eup %1351 }
 0x7d5   : > { %v865_v43 = vmul.f32 %v1352_v41, %v857_v32 }
 0x7d7   : > { %v872_v45 = vmul.f32 %v1164_v42, %v865_v43 }
 0x7d9   : > { %v879_v46 = vadd.f32 %v1165_v44, %v872_v45 }
 0x7db   : > { %v880_v47 = vpack.c.bf16 %v879_v46, %v879_v46 }
 0x7dd   : > { %1255 = vmatmul.mubr.msk.bf16.vlgmr.msra.gmra.mxu0 %vm441_vm0, %v880_v47 }
 0x89d   : > { %v941_v55 = vpop.f32.mrf.mxu0 }
 0x89e   : > { %v942_v56 = vadd.f32 %v1166_v54, %v941_v55 }
 0x89f   : > { %v1256_v57 = vpop.f32.mrf.mxu0 }
 0x8a0   : > { %v948_v58 = vmul.f32 0.70710677, %v942_v56  ;;  %v947_v9 = vmul.f32 0.5, %v942_v56 }
 0x8a1   : > { %v944_v59 = vpop.f32.mrf.mxu0 }
 0x8a2   : > { %1353 = verf.f32 %v948_v58 }
 0x8a3   : > { %v1257_v60 = vpop.f32.mrf.mxu0 }
 0x8af   : > { %v1354_v61 = vpop.eup %1353 }
 0x8b0   : > { %v950_v62 = vadd.f32 1.0, %v1354_v61 }
 0x8b2   : > { %v951_v63 = vmul.f32 %v950_v62, %v947_v9 }
 0x8b4   : > { %v952_v0 = vpack.c.bf16 %v951_v63, %v951_v63 }
 0x8b6   : > { %1275 = vmatmul.mubr.bf16.vlgmr.msra.gmra.mxu1 %v952_v0 }
 0x976   : > { %v1058_v3 = vpop.f32.mrf.mxu1 }
 0x977   : > { %v1059_v4 = vadd.f32 %v1170_v2, %v1058_v3 }
 0x978   : > { %v1276_v5 = vpop.f32.mrf.mxu1 }
 0x979   : > { %v1064_v6 = vadd.f32 %v1059_v4, %v1614_v26 }
 0x97a   : > { %v1061_v7 = vpop.f32.mrf.mxu1 }
 0x97b   : > { %v1065_v8 = vpack.c.bf16 %v1064_v6, %v1064_v6 }
 0x97c   : > { %v1277_v10 = vpop.f32.mrf.mxu1 }
 0x97d   : > { %1067 = vst.msk [vmem:[%s431_s22] sm:$0xf] %vm1066_vm8, %v1065_v8 }
 0x97e   : > { %1368 = shalt.err (!%p1365_p3)
}
 0x97f   : > { %s1369_s0 = scalar_lea.hbm %s1677_s1, 64  ;;  %s1373_s22 = scalar_lea.hbm %s1725_s13, 128 }
 0x980   : > { %p1370_p4 = scmp.ne.s32.totalorder %s1677_s1, %s1369_s0  ;;  %p1374_p9 = scmp.lt.s32.totalorder %s1677_s1, %s1725_s13 }
 0x981   : > { %p1375_p10 = scmp.lt.s32.totalorder %s1373_s22, %s1369_s0 }
 0x982   : > { %p1371_p7 = pnand %p1370_p4, %p1534_p5 }
 0x983   : > { %p1376_p11 = por %p1375_p10, %p1374_p9 }
 0x984   : > { %p1372_p8 = pneg %p1371_p7 }
 0x986   : > { %p1377_p12 = pnand %p1376_p11, %p1372_p8 }
 0x988   : > { %1380 = shalt.err (!%p1377_p12)
}
 0x989   : > { %1278 = dma.vmem_to_hbm [thread:$0]  (%p1534_p5), %s1083_s23, 64, %s1677_s1, %s1069_s16  }
 0x98a PF: > { %p1284_p13 = scmp.ge.s32.totalorder %s1415_s28, 2  ;;  %s1094_s2 = sand.u32 1, %s1403_s25  }
 0x98b   : > { %s1095_s20 = scalar_lea.sflag [#allocation5], %s1094_s2 }
 0x98c   : > { %p1281_p0 = pnand %p1284_p13, %p1538_p6 }
 0x98e   : > { %p1282_p1 = pneg %p1281_p0 }
 0x990   : > { %1398 = dma.done.wait (%p1282_p1), %s1095_s20, 64  }
 0x991   : > { %1400 = vsyncadd (%p1282_p1), %s1095_s20, 4294967232  ;;  %p23_p2 = scmp.ge.s32.totalorder %s1521_s14, 4   ;;  %s1734_s25 = smov %s1407_s26 }
 0x992   : > { %s1735_s26 = smov %s1411_s27  ;;  %s1736_s27 = smov %s1532_s17 }
 0x993   : > { %s1737_s28 = smov %s1521_s14  ;;  %25 = sbr.rel (!%p23_p2) target bundleno = 7 (0x7), region = 107 }
 0x998   :  { %1100 = vsyncpa [#allocation5], 1 }
 0x999   :  { %1102 = vsyncpa [#allocation5 + $0x1], 1 }

// kernel: tpu_custom_call.1
= control target key start
LH: loop header
LB: loop body
LE: loop exit
PB: predicated region body
PF: predicated region fallthrough
CT: control target
= control target key end

     0   :  { %s1712_s0 = inlined_call_operand.vmem [shape: bf16[2,8,32], index: 0, kind: input, shape index: {}]   ;;  %s1713_s1 = inlined_call_operand.vmem [shape: f32[1,32], index: 1, kind: input, shape index: {}]   ;;  %s1714_s2 = inlined_call_operand.vmem [shape: f32[1,32], index: 2, kind: input, shape index: {}]   ;;  %s1715_s3 = inlined_call_operand.vmem [shape: bf16[32,96], index: 3, kind: input, shape index: {}]   ;;  %s1716_s4 = inlined_call_operand.vmem [shape: f32[1,96], index: 4, kind: input, shape index: {}]   ;;  %s1717_s5 = inlined_call_operand.vmem [shape: bf16[32,32], index: 5, kind: input, shape index: {}]   ;;  %s1718_s6 = inlined_call_operand.vmem [shape: f32[1,32], index: 6, kind: input, shape index: {}]   ;;  %s1719_s7 = inlined_call_operand.vmem [shape: f32[1,32], index: 7, kind: input, shape index: {}]   ;;  %s1720_s8 = inlined_call_operand.vmem [shape: f32[1,32], index: 8, kind: input, shape index: {}]   ;;  %s1721_s9 = inlined_call_operand.vmem [shape: bf16[32,128], index: 9, kind: input, shape index: {}]   ;;  %s1722_s10 = inlined_call_operand.vmem [shape: f32[1,128], index: 10, kind: input, shape index: {}]   ;;  %s1723_s11 = inlined_call_operand.vmem [shape: bf16[128,32], index: 11, kind: input, shape index: {}]   ;;  %s1724_s12 = inlined_call_operand.vmem [shape: f32[1,32], index: 12, kind: input, shape index: {}]   ;;  %s1725_s13 = inlined_call_operand.hbm [shape: bf16[2,8,32], index: 13, kind: output, shape index: {}]  }
   0x1   :  { %1726 = sst [smem:[#allocation7_spill]] %s1712_s0 }
   0x2   :  { %1727 = sst [smem:[#allocation8_spill]] %s1713_s1 }
   0x3   :  { %1728 = sst [smem:[#allocation9_spill]] %s1714_s2 }
   0x4   :  { %18 = vsyncpa [#allocation5], 0 }
   0x5   :  { %20 = vsyncpa [#allocation5 + $0x1], 0  ;;  %s1496_s25 = smov 0   ;;  %s1498_s26 = smov 0  }
   0x6   :  { %s1500_s27 = smov 0   ;;  %s1502_s28 = smov 0  }
   0x7 LB: > { %s1517_s29 = sadd.s32 4294967295, %s1415_s28   ;;  %s1141_s30 = sadd.s32 4294967294, %s1415_s28   ;;  %s1415_s28 = sphi %s1502_s28, %s1737_s28   ;;  %s1411_s27 = sphi %s1500_s27, %s1736_s27   ;;  %s1407_s26 = sphi %s1498_s26, %s1735_s26   ;;  %s1403_s25 = sphi %s1496_s25, %s1734_s25  }
   0x8   : > { %s1521_s14 = sadd.s32 1, %s1415_s28   ;;  %s311_s15 = sadd.s32 1, %s1411_s27 }
   0x9   : > { %s308_s16 = ssub.s32 %s1415_s28, %s1521_s14  ;;  %p321_p0 = scmp.ne.s32.totalorder %s1411_s27, %s1407_s26 }
   0xa   : > { %p309_p1 = scmp.eq.s32.totalorder %s308_s16, 0  ;;  %p322_p2 = scmp.eq.s32.totalorder %s1517_s29, 1 }
   0xb   : > { %p327_p3 = scmp.ne.s32.totalorder %s1407_s26, %s1403_s25  ;;  %p328_p4 = scmp.eq.s32.totalorder %s1141_s30, 1 }
   0xc   : > { %s1532_s17 = scalar_select %p309_p1, %s1411_s27, %s311_s15  }
   0xd   : > { %p1534_p5 = por %p322_p2, %p321_p0  ;;  %p1538_p6 = por %p328_p4, %p327_p3 }
   0xe   : > { %p1144_p7 = scmp.ge.s32.totalorder %s1415_s28, 1  ;;  %p389_p8 = scmp.lt.s32.totalorder %s1415_s28, 3 }
  0x10   : > { %p390_p9 = pnand %p1144_p7, %p389_p8 }
  0x11   : > { %p432_p10 = scmp.lt.s32.totalorder (!%p390_p9), %s1517_s29, 1  ;;  %s1731_s0 = sld [smem:[#allocation7_spill]] (!%p390_p9) }
  0x12   : > { %393 = sbr.rel (%p390_p9) target bundleno = 2442 (0x98a), region = 72  ;;  %s1732_s1 = sld [smem:[#allocation8_spill]] (!%p390_p9) }
  0x13   : > { %s1733_s2 = sld [smem:[#allocation9_spill]] (!%p390_p9)  ;;  %s1419_s16 = smov (!%p390_p9), 112  }
  0x14   : > { %s1422_s22 = smov (!%p390_p9), 48   ;;  %s1423_s23 = smov (!%p390_p9), 64  }
  0x15   : > { %s429_s30 = sand.u32 (!%p390_p9), 1, %s1407_s26  }
  0x16   : > { %s1145_s15 = sshll.u32 (!%p390_p9), %s429_s30, 2 }
  0x17   : > { %s433_s20 = scalar_select %p432_p10, %s1517_s29, 1  ;;  %vm441_vm0 = vcmask 261120   ;;  %v1325_v8 = vld [vmem:[%s1715_s3 + $0x8] sm:$0xff]   ;;  %v1417_v9 = vmov 0.0   ;;  %vm1418_vm1 = vmmov 0   ;;  %v1326_v10 = vld [vmem:[%s1715_s3] sm:$0xff]  }
  0x18   : > { %1210 = vmatprep.subr.bf16.mxu0 %v1417_v9  ;;  %1214 = vmatprep.mubr.msk.bf16.mxu0 %vm1418_vm1, %v1417_v9  ;;  %v1147_v15 = vld [vmem:[%s1732_s1] ss:$0 sm:$0xff]  ;;  %vm538_vm2 = vcmask 781312   ;;  %vm546_vm3 = vcmask 130048   ;;  %vm594_vm4 = vcmask 64512   ;;  %vm612_vm5 = vcmask 1043456  }
  0x19   : > { %s1146_s21 = sshll.u32 %s433_s20, 2  ;;  %1211 = vmatpush3.bf16.msra.mxu0 %v1325_v8  ;;  %1230 = vmatprep.subr.bf16.mxu1 %v1417_v9  ;;  %v1148_v17 = vld [vmem:[%s1733_s2] ss:$0 sm:$0xff]  ;;  %s1420_s20 = smov 96   ;;  %vm657_vm6 = vcmask 125952   ;;  %vm781_vm7 = vcmask 257152  }
  0x1a   : > { %s435_s24 = scalar_lea.vmem %s1731_s0, %s1146_s21  ;;  %1212 = vmatprep.subr.bf16.mxu0 %v1417_v9  ;;  %1232 = vmatprep.mubr.msk.bf16.mxu1 %vm1418_vm1, %v1417_v9  ;;  %v1149_v21 = vld [vmem:[%s1716_s4] ss:$0 sm:$0xff]  ;;  %s1421_s21 = smov 80   ;;  %vm1066_vm8 = vcmask 257024  }
  0x1b   : > { %v437_v0 = vld [vmem:[%s435_s24] sm:$0xf] }
  0x1c   : > { %v1549_v1 = vunpack.c.l.bf16 %v437_v0 }
  0x1d   : > { %1213 = vmatpush3.bf16.msra.mxu0 %v1326_v10  ;;  %v1330_v10 = vld [vmem:[%s1717_s5] sm:$0xff]  }
  0x1e   : > { %v442_v2 = vsel %vm441_vm0, %v1549_v1, 0.0  ;;  %1218 = vmatprep.subr.bf16.mxu0 %v1417_v9 }
  0x1f   : > { %443 = vadd.xlane.f32.xlu0 %v442_v2 }
  0xa8   : > { %v444_v3 = vpop.xlane.xlu0 %443 }
  0xa9   : > { %v446_v4 = vmul.f32 0.03125, %v444_v3 }
  0xab   : > { %v447_v5 = vsub.f32 %v1549_v1, %v446_v4 }
  0xad   : > { %v448_v6 = vmul.f32 %v447_v5, %v447_v5 }
  0xaf   : > { %v449_v7 = vsel %vm441_vm0, %v448_v6, 0.0 }
  0xb0   : > { %450 = vadd.xlane.f32.xlu0 %v449_v7  ;;  %v1329_v7 = vld [vmem:[%s1717_s5 + $0x8] sm:$0xff]  }
 0x139   : > { %v451_v11 = vpop.xlane.xlu0 %450 }
 0x13a   : > { %v452_v12 = vmul.f32 0.03125, %v451_v11 }
 0x13c   : > { %v453_v13 = vadd.f32 1e-05, %v452_v12 }
 0x13e   : > { %1341 = vrsqrt.f32 %v453_v13 }
 0x14b   : > { %v1342_v14 = vpop.eup %1341 }
 0x14c   : > { %v455_v16 = vmul.f32 %v1342_v14, %v447_v5 }
 0x14e   : > { %v462_v18 = vmul.f32 %v1147_v15, %v455_v16 }
 0x150   : > { %v469_v19 = vadd.f32 %v1148_v17, %v462_v18 }
 0x152   : > { %v470_v20 = vpack.c.bf16 %v469_v19, %v469_v19 }
 0x154   : > { %1215 = vmatmul.mubr.msk.bf16.vlgmr.msra.gmra.mxu0 %vm441_vm0, %v470_v20 }
 0x155   : > { %1220 = vmatprep.mubr.msk.bf16.mxu0 %vm1418_vm1, %v1417_v9 }
 0x214   : > { %v531_v22 = vpop.f32.mrf.mxu0 }
 0x215   : > { %v532_v23 = vadd.f32 %v1149_v21, %v531_v22  ;;  %v1160_v22 = vld [vmem:[%s1718_s6] ss:$0 sm:$0xff] }
 0x216   : > { %v1216_v24 = vpop.f32.mrf.mxu0 }
 0x217   : > { %v537_v25 = vpack.c.bf16 %v532_v23, %v532_v23 }
 0x218   : > { %v534_v26 = vpop.f32.mrf.mxu0 }
 0x219   : > { %539 = vst.msk [vmem:[#allocation2] sm:$0xf] %vm538_vm2, %v537_v25 }
 0x21a   : > { %v1217_v27 = vpop.f32.mrf.mxu0 }
 0x220   : > { %v1327_v28 = vld [vmem:[#allocation2] ss:$0 sps:$4 sm:$0xff]  }
 0x221   : > { %v540_v29 = vld [vmem:[#allocation2] sm:$0xf]  ;;  %663 = vrot.lane.b32.xlu0 %v1327_v28, %s1419_s16  ;;  %s1069_s16 = scalar_lea.sflag [#allocation5], %s429_s30 }
 0x222   : > { %v1153_v30 = vcombine.low %v540_v29, %v540_v29 }
 0x224   : > { %544 = vrot.lane.b32.xlu1 %v1153_v30, %s1420_s20  ;;  %s1424_s20 = smov 16  }
 0x228   : > { %665 = vrot.lane.b32.xlu1 %v1327_v28, %s1421_s21  ;;  %s1180_s21 = sshll.u32 %s1517_s29, 6  ;;  %s1425_s29 = smov [#allocation4]  }
 0x229   : > { %s1677_s1 = scalar_lea.hbm %s1725_s13, %s1180_s21 }
 0x293   : > { %v664_v35 = vpop.permute.xlu0 %663 }
 0x296   : > { %v545_v31 = vpop.permute.xlu1 %544 }
 0x297   : > { %v551_v32 = vsel %vm546_vm3, %v545_v31, 0 }
 0x298   : > { %1219 = vmatpush3.bf16.xpose.msra.mxu0 %v551_v32 }
 0x299   : > { %1224 = vmatprep.subr.bf16.mxu0 %v1417_v9 }
 0x29a   : > { %v666_v33 = vpop.permute.xlu1 %665 }
 0x29b   : > { %v671_v34 = vsel %vm546_vm3, %v666_v33, 0 }
 0x29c   : > { %1231 = vmatpush3.bf16.xpose.msra.mxu1 %v671_v34 }
 0x29d   : > { %1242 = vmatprep.subr.bf16.mxu1 %v1417_v9 }
 0x29f   : > { %1221 = vmatmul.mubr.msk.bf16.vlgmr.msra.gmra.mxu0 %vm546_vm3, %v540_v29 }
 0x2a0   : > { %1226 = vmatprep.mubr.msk.bf16.mxu0 %vm1418_vm1, %v1417_v9 }
 0x2a3   : > { %1233 = vmatmul.mubr.msk.bf16.vlgmr.msra.gmra.mxu1 %vm546_vm3, %v664_v35  ;;  %v1331_v35 = vld [vmem:[%s1721_s9 + $0x8] sm:$0xff]  }
 0x2a4   : > { %1246 = vmatprep.mubr.msk.bf16.mxu1 %vm1418_vm1, %v1417_v9  ;;  %1243 = vmatpush3.bf16.msra.mxu1 %v1329_v7 }
 0x2a5   : > { %1244 = vmatprep.subr.bf16.mxu1 %v1417_v9 }
 0x2a8   : > { %1245 = vmatpush3.bf16.msra.mxu1 %v1330_v10 }
 0x2a9   : > { %1258 = vmatprep.subr.bf16.mxu1 %v1417_v9 }
 0x35f   : > { %v587_v36 = vpop.f32.mrf.mxu0 }
 0x360   : > { %v593_v37 = vmul.f32 0.25, %v587_v36  ;;  %v1333_v36 = vld [vmem:[%s1723_s11 + $0x38] sm:$0xff]  }
 0x361   : > { %v1222_v38 = vpop.f32.mrf.mxu0 }
 0x362   : > { %v595_v39 = vsel %vm594_vm4, %v593_v37, -inf }
 0x363   : > { %v707_v40 = vpop.f32.mrf.mxu1  ;;  %596 = vmax.xlane.f32.xlu1 %v595_v39  ;;  %v590_v41 = vpop.f32.mrf.mxu0 }
 0x364   : > { %v713_v42 = vmul.f32 0.25, %v707_v40 }
 0x365   : > { %v1223_v43 = vpop.f32.mrf.mxu0  ;;  %v1234_v44 = vpop.f32.mrf.mxu1 }
 0x366   : > { %v714_v45 = vsel %vm594_vm4, %v713_v42, -inf  ;;  %v1165_v44 = vld [vmem:[%s1720_s8] ss:$0 sm:$0xff] }
 0x367   : > { %715 = vmax.xlane.f32.xlu0 %v714_v45  ;;  %v710_v46 = vpop.f32.mrf.mxu1 }
 0x369   : > { %v1235_v47 = vpop.f32.mrf.mxu1 }
 0x37d   : > { %726 = vrot.lane.b32.xlu0 %v1327_v28, %s1422_s22  ;;  %s431_s22 = scalar_lea.vmem [#allocation4], %s1145_s15  ;;  %s1359_s15 = sshll.u32 %s1425_s29, 4  ;;  %s1360_s15 = int_to_ptr.vmem [resolvable:$false] %s1359_s15 }
 0x37e   : > { %s1361_s2 = scalar_lea.vmem %s1360_s15, 128 }
 0x3ec   : > { %v597_v48 = vpop.xlane.xlu1 %596 }
 0x3ed   : > { %v598_v49 = vsub.f32 %v593_v37, %v597_v48  ;;  %v1334_v37 = vld [vmem:[%s1723_s11 + $0x30] sm:$0xff]   ;;  %v1335_v48 = vld [vmem:[%s1723_s11 + $0x28] sm:$0xff]  }
 0x3ef   : > { %v599_v50 = vmul.f32 1.442695, %v598_v49  ;;  %v1336_v49 = vld [vmem:[%s1723_s11 + $0x20] sm:$0xff]  }
 0x3f0   : > { %v716_v51 = vpop.xlane.xlu0 %715 }
 0x3f1   : > { %1343 = vpow2.f32 %v599_v50  ;;  %v717_v52 = vsub.f32 %v713_v42, %v716_v51  ;;  %v1164_v42 = vld [vmem:[%s1719_s7] ss:$0 sm:$0xff]  ;;  %v1337_v50 = vld [vmem:[%s1723_s11 + $0x18] sm:$0xff]   ;;  %v1338_v51 = vld [vmem:[%s1723_s11 + $0x10] sm:$0xff]  }
 0x3f3   : > { %v718_v53 = vmul.f32 1.442695, %v717_v52  ;;  %v1339_v52 = vld [vmem:[%s1723_s11 + $0x8] sm:$0xff]  }
 0x3f4   : > { %v727_v0 = vpop.permute.xlu0 %726 }
 0x3f5   : > { %1345 = vpow2.f32 %v718_v53  ;;  %v732_v4 = vsel %vm612_vm5, %v727_v0, 0  ;;  %v1340_v53 = vld [vmem:[%s1723_s11] sm:$0xff]  }
 0x3fe   : > { %v1344_v54 = vpop.eup %1343 }
 0x3ff   : > { %v601_v55 = vsel %vm594_vm4, %v1344_v54, 0.0 }
 0x400   : > { %602 = vadd.xlane.f32.xlu1 %v601_v55 }
 0x402   : > { %v1346_v56 = vpop.eup %1345 }
 0x403   : > { %v720_v57 = vsel %vm594_vm4, %v1346_v56, 0.0 }
 0x404   : > { %721 = vadd.xlane.f32.xlu1 %v720_v57 }
 0x415   : > { %607 = vrot.lane.b32.xlu1 %v1153_v30, %s1423_s23  ;;  %s1082_s23 = sshll.u32 %s431_s22, 4  ;;  %s1083_s23 = int_to_ptr.vmem [resolvable:$true] %s1082_s23 }
 0x416   : > { %p1362_p0 = scmp.lt.s32.totalorder %s1083_s23, %s1360_s15 }
 0x489   : > { %v603_v58 = vpop.xlane.xlu1 %602 }
 0x48a   : > { %1347 = vrcp.f32 %v603_v58 }
 0x48d   : > { %v722_v59 = vpop.xlane.xlu1 %721 }
 0x48e   : > { %1349 = vrcp.f32 %v722_v59 }
 0x491   : > { %v608_v60 = vpop.permute.xlu1 %607 }
 0x492   : > { %v614_v61 = vsel %vm612_vm5, %v608_v60, 0 }
 0x493   : > { %1225 = vmatpush3.bf16.msra.mxu0 %v614_v61 }
 0x494   : > { %1236 = vmatprep.subr.bf16.mxu0 %v1417_v9 }
 0x497   : > { %v1348_v62 = vpop.eup %1347 }
 0x498   : > { %v605_v63 = vmul.f32 %v1348_v62, %v1344_v54  ;;  %v1166_v54 = vld [vmem:[%s1722_s10] ss:$0 sm:$0xff] }
 0x49a   : > { %v606_v2 = vpack.c.bf16 %v605_v63, %v605_v63 }
 0x49b   : > { %v1350_v3 = vpop.eup %1349 }
 0x49c   : > { %1227 = vmatmul.mubr.msk.bf16.vlgmr.msra.gmra.mxu0 %vm594_vm4, %v606_v2  ;;  %v724_v5 = vmul.f32 %v1350_v3, %v1346_v56  ;;  %v1170_v2 = vld [vmem:[%s1724_s12] ss:$0 sm:$0xff] }
 0x49d   : > { %1237 = vmatpush3.bf16.msra.mxu0 %v732_v4  ;;  %1238 = vmatprep.mubr.msk.bf16.mxu0 %vm1418_vm1, %v1417_v9 }
 0x49e   : > { %1250 = vmatprep.subr.bf16.mxu0 %v1417_v9  ;;  %v725_v6 = vpack.c.bf16 %v724_v5, %v724_v5 }
 0x4a4   : > { %1239 = vmatmul.mubr.msk.bf16.vlgmr.msra.gmra.mxu0 %vm594_vm4, %v725_v6 }
 0x4a5   : > { %1254 = vmatprep.mubr.msk.bf16.mxu0 %vm1418_vm1, %v1417_v9  ;;  %1251 = vmatpush3.bf16.msra.mxu0 %v1331_v35 }
 0x4a6   : > { %1252 = vmatprep.subr.bf16.mxu0 %v1417_v9 }
 0x55c   : > { %v650_v8 = vpop.f32.mrf.mxu0 }
 0x55d   : > { %v656_v11 = vpack.c.bf16 %v650_v8, %v650_v8 }
 0x55e   : > { %v1228_v12 = vpop.f32.mrf.mxu0 }
 0x55f   : > { %658 = vst.msk [vmem:[#allocation3] sm:$0xf] %vm657_vm6, %v656_v11 }
 0x560   : > { %v653_v13 = vpop.f32.mrf.mxu0 }
 0x562   : > { %v1229_v14 = vpop.f32.mrf.mxu0 }
 0x564   : > { %v768_v15 = vpop.f32.mrf.mxu0 }
 0x565   : > { %v1183_v16 = vpack.c.bf16 %v768_v15, %v768_v15 }
 0x566   : > { %v1240_v17 = vpop.f32.mrf.mxu0 }
 0x567   : > { %778 = vrot.lane.b32.xlu1 %v1183_v16, %s1424_s20  ;;  %s1355_s20 = scalar_lea.vmem %s1083_s23, 64 }
 0x568   : > { %v771_v18 = vpop.f32.mrf.mxu0  ;;  %p1356_p11 = scmp.ne.s32.totalorder %s1083_s23, %s1355_s20  ;;  %p1363_p1 = scmp.lt.s32.totalorder %s1361_s2, %s1355_s20 }
 0x56a   : > { %v1241_v19 = vpop.f32.mrf.mxu0  ;;  %p1357_p12 = pnand %p1356_p11, %p1534_p5  ;;  %p1364_p2 = por %p1363_p1, %p1362_p0 }
 0x56c   : > { %p1358_p13 = pneg %p1357_p12 }
 0x56e   : > { %p1365_p3 = pnand %p1364_p2, %p1358_p13 }
 0x5d9   : > { %v779_v20 = vpop.permute.xlu1 %778 }
 0x5da   : > { %782 = vst.msk [vmem:[#allocation3] sm:$0xf] %vm781_vm7, %v779_v20 }
 0x5e1   : > { %v783_v21 = vld [vmem:[#allocation3] sm:$0xf] }
 0x5e2   : > { %1247 = vmatmul.mubr.msk.bf16.vlgmr.msra.gmra.mxu1 %vm441_vm0, %v783_v21 }
 0x5e3   : > { %1274 = vmatprep.mubr.msk.bf16.mxu1 %vm1418_vm1, %v1417_v9  ;;  %1259 = vmatpush3.bf16.msra.mxu1 %v1333_v36 }
 0x5e4   : > { %1260 = vmatprep.subr.bf16.mxu1 %v1417_v9 }
 0x5e7   : > { %1261 = vmatpush3.bf16.msra.mxu1 %v1334_v37 }
 0x5e8   : > { %1262 = vmatprep.subr.bf16.mxu1 %v1417_v9 }
 0x5eb   : > { %1263 = vmatpush3.bf16.msra.mxu1 %v1335_v48 }
 0x5ec   : > { %1264 = vmatprep.subr.bf16.mxu1 %v1417_v9 }
 0x5ef   : > { %1265 = vmatpush3.bf16.msra.mxu1 %v1336_v49 }
 0x5f0   : > { %1266 = vmatprep.subr.bf16.mxu1 %v1417_v9 }
 0x5f3   : > { %1267 = vmatpush3.bf16.msra.mxu1 %v1337_v50 }
 0x5f4   : > { %1268 = vmatprep.subr.bf16.mxu1 %v1417_v9 }
 0x5f7   : > { %1269 = vmatpush3.bf16.msra.mxu1 %v1338_v51 }
 0x5f8   : > { %1270 = vmatprep.subr.bf16.mxu1 %v1417_v9 }
 0x5fb   : > { %1271 = vmatpush3.bf16.msra.mxu1 %v1339_v52 }
 0x5fc   : > { %1272 = vmatprep.subr.bf16.mxu1 %v1417_v9 }
 0x5ff   : > { %1273 = vmatpush3.bf16.msra.mxu1 %v1340_v53 }
 0x6a2   : > { %v844_v23 = vpop.f32.mrf.mxu1 }
 0x6a3   : > { %v845_v24 = vadd.f32 %v1160_v22, %v844_v23 }
 0x6a4   : > { %v1248_v25 = vpop.f32.mrf.mxu1 }
 0x6a5   : > { %v1614_v26 = vadd.f32 %v845_v24, %v1549_v1  ;;  %v1332_v1 = vld [vmem:[%s1721_s9] sm:$0xff]  }
 0x6a6   : > { %v847_v27 = vpop.f32.mrf.mxu1  ;;  %1253 = vmatpush3.bf16.msra.mxu0 %v1332_v1 }
 0x6a7   : > { %v853_v28 = vsel %vm441_vm0, %v1614_v26, 0.0 }
 0x6a8   : > { %854 = vadd.xlane.f32.xlu1 %v853_v28  ;;  %v1249_v29 = vpop.f32.mrf.mxu1 }
 0x731   : > { %v855_v30 = vpop.xlane.xlu1 %854 }
 0x732   : > { %v856_v31 = vmul.f32 0.03125, %v855_v30 }
 0x734   : > { %v857_v32 = vsub.f32 %v1614_v26, %v856_v31 }
 0x736   : > { %v858_v33 = vmul.f32 %v857_v32, %v857_v32 }
 0x738   : > { %v859_v34 = vsel %vm441_vm0, %v858_v33, 0.0 }
 0x739   : > { %860 = vadd.xlane.f32.xlu0 %v859_v34 }
 0x7c2   : > { %v861_v38 = vpop.xlane.xlu0 %860 }
 0x7c3   : > { %v862_v39 = vmul.f32 0.03125, %v861_v38 }
 0x7c5   : > { %v863_v40 = vadd.f32 1e-05, %v862_v39 }
 0x7c7   : > { %1351 = vrsqrt.f32 %v863_v40 }
 0x7d4   : > { %v1352_v41 = vpop.eup %1351 }
 0x7d5   : > { %v865_v43 = vmul.f32 %v1352_v41, %v857_v32 }
 0x7d7   : > { %v872_v45 = vmul.f32 %v1164_v42, %v865_v43 }
 0x7d9   : > { %v879_v46 = vadd.f32 %v1165_v44, %v872_v45 }
 0x7db   : > { %v880_v47 = vpack.c.bf16 %v879_v46, %v879_v46 }
 0x7dd   : > { %1255 = vmatmul.mubr.msk.bf16.vlgmr.msra.gmra.mxu0 %vm441_vm0, %v880_v47 }
 0x89d   : > { %v941_v55 = vpop.f32.mrf.mxu0 }
 0x89e   : > { %v942_v56 = vadd.f32 %v1166_v54, %v941_v55 }
 0x89f   : > { %v1256_v57 = vpop.f32.mrf.mxu0 }
 0x8a0   : > { %v948_v58 = vmul.f32 0.70710677, %v942_v56  ;;  %v947_v9 = vmul.f32 0.5, %v942_v56 }
 0x8a1   : > { %v944_v59 = vpop.f32.mrf.mxu0 }
 0x8a2   : > { %1353 = verf.f32 %v948_v58 }
 0x8a3   : > { %v1257_v60 = vpop.f32.mrf.mxu0 }
 0x8af   : > { %v1354_v61 = vpop.eup %1353 }
 0x8b0   : > { %v950_v62 = vadd.f32 1.0, %v1354_v61 }
 0x8b2   : > { %v951_v63 = vmul.f32 %v950_v62, %v947_v9 }
 0x8b4   : > { %v952_v0 = vpack.c.bf16 %v951_v63, %v951_v63 }
 0x8b6   : > { %1275 = vmatmul.mubr.bf16.vlgmr.msra.gmra.mxu1 %v952_v0 }
 0x976   : > { %v1058_v3 = vpop.f32.mrf.mxu1 }
 0x977   : > { %v1059_v4 = vadd.f32 %v1170_v2, %v1058_v3 }
 0x978   : > { %v1276_v5 = vpop.f32.mrf.mxu1 }
 0x979   : > { %v1064_v6 = vadd.f32 %v1059_v4, %v1614_v26 }
 0x97a   : > { %v1061_v7 = vpop.f32.mrf.mxu1 }
 0x97b   : > { %v1065_v8 = vpack.c.bf16 %v1064_v6, %v1064_v6 }
 0x97c   : > { %v1277_v10 = vpop.f32.mrf.mxu1 }
 0x97d   : > { %1067 = vst.msk [vmem:[%s431_s22] sm:$0xf] %vm1066_vm8, %v1065_v8 }
 0x97e   : > { %1368 = shalt.err (!%p1365_p3)
}
 0x97f   : > { %s1369_s0 = scalar_lea.hbm %s1677_s1, 64  ;;  %s1373_s22 = scalar_lea.hbm %s1725_s13, 128 }
 0x980   : > { %p1370_p4 = scmp.ne.s32.totalorder %s1677_s1, %s1369_s0  ;;  %p1374_p9 = scmp.lt.s32.totalorder %s1677_s1, %s1725_s13 }
 0x981   : > { %p1375_p10 = scmp.lt.s32.totalorder %s1373_s22, %s1369_s0 }
 0x982   : > { %p1371_p7 = pnand %p1370_p4, %p1534_p5 }
 0x983   : > { %p1376_p11 = por %p1375_p10, %p1374_p9 }
 0x984   : > { %p1372_p8 = pneg %p1371_p7 }
 0x986   : > { %p1377_p12 = pnand %p1376_p11, %p1372_p8 }
 0x988   : > { %1380 = shalt.err (!%p1377_p12)
}
 0x989   : > { %1278 = dma.vmem_to_hbm [thread:$0]  (%p1534_p5), %s1083_s23, 64, %s1677_s1, %s1069_s16  }
 0x98a PF: > { %p1284_p13 = scmp.ge.s32.totalorder %s1415_s28, 2  ;;  %s1094_s2 = sand.u32 1, %s1403_s25  }
 0x98b   : > { %s1095_s20 = scalar_lea.sflag [#allocation5], %s1094_s2 }
 0x98c   : > { %p1281_p0 = pnand %p1284_p13, %p1538_p6 }
 0x98e   : > { %p1282_p1 = pneg %p1281_p0 }
 0x990   : > { %1398 = dma.done.wait (%p1282_p1), %s1095_s20, 64  }
 0x991   : > { %1400 = vsyncadd (%p1282_p1), %s1095_s20, 4294967232  ;;  %p23_p2 = scmp.ge.s32.totalorder %s1521_s14, 4   ;;  %s1734_s25 = smov %s1407_s26 }
 0x992   : > { %s1735_s26 = smov %s1411_s27  ;;  %s1736_s27 = smov %s1532_s17 }
 0x993   : > { %s1737_s28 = smov %s1521_s14  ;;  %25 = sbr.rel (!%p23_p2) target bundleno = 7 (0x7), region = 107 }
 0x998   :  { %1100 = vsyncpa [#allocation5], 1 }
 0x999   :  { %1102 = vsyncpa [#allocation5 + $0x1], 1 }

</bundles_post_ra>
